<compile_context>
chip_gen: v7x
topology: tpu7x:2x2x1
jax: 0.10.0
libtpu: 0.0.40
codegen_flags: <defaults>
</compile_context>

<pallas_src>
import jax
import jax.numpy as jnp
from jax import lax
from jax.experimental import pallas as pl
from jax.experimental.pallas import tpu as pltpu

# ---- configuration (small shapes consistent with the module) ----
GRID_SIZE = 50                       # `grid_size` in the PyTorch file
BATCH = 2
IN_C, IN_H, IN_W = 1, 8, 8
INPUT_DIM = IN_C * IN_H * IN_W       # 64
INTERMEDIATE_DIM = 128
HIDDEN_DIM = 64
D_MODEL = 32
NHEAD = 4                            # numerically irrelevant for seq_len == 1
NUM_LAYERS = 2
DIM_FEEDFORWARD = 2048               # PyTorch TransformerEncoderLayer default
LN_EPS = 1e-5
OUT_DIM = GRID_SIZE * GRID_SIZE      # 2500


def _r128(n):
    return ((n + 127) // 128) * 128


def _r8(n):
    return ((n + 7) // 8) * 8


OUT_DIM_PAD = _r128(OUT_DIM)         # 2560 = 20 * 128 (lane-dense final store)

# ---- packed bias/LN layout: (8, 2560) f32, every segment 128-lane aligned inside a row ----
BIAS_ROWS = 8
BIAS_COLS = OUT_DIM_PAD              # 2560 (widest segment: the padded fc4 bias)
# row 0: all the small (<=128) vectors
C_B1 = 0                             # fc1 bias (128)
C_B2 = 128                           # fc2 bias (64)
C_B3 = 256                           # fc3 bias (32)
C_LAYER0 = 384                       # per-encoder-layer small params start here
LAYER_CSTRIDE = 768                  # 6 x 128-aligned segments per layer
CL_ATTN_B, CL_LN1W, CL_LN1B, CL_F2B, CL_LN2W, CL_LN2B = 0, 128, 256, 384, 512, 640
# rows 1..NUM_LAYERS: FFN linear1 bias (2048) for each layer
ROW_F1B = 1
# row 1+NUM_LAYERS: padded fc4 bias (2560)
ROW_B4 = 1 + NUM_LAYERS
assert C_LAYER0 + NUM_LAYERS * LAYER_CSTRIDE <= BIAS_COLS
assert ROW_B4 < BIAS_ROWS


def _layer_norm(x, w, b):
    # f32 math, biased variance (PyTorch LayerNorm semantics).
    mu = jnp.mean(x, axis=-1, keepdims=True)
    xc = x - mu
    var = jnp.mean(xc * xc, axis=-1, keepdims=True)
    return xc * lax.rsqrt(var + LN_EPS) * w + b


def _lin_to_transformer_kernel(
    x_ref, w1_ref, w2_ref, w3_ref, wattn_ref, bias_ref,      # VMEM inputs
    f1w_hbm, f2w_hbm, w4_hbm,                                # HBM inputs (manual DMA)
    out_ref,                                                 # VMEM output
    f1w_vmem, f2w_vmem, w4_vmem, sem):                       # scratch
    # Per-layer FFN weight copies, issued in consumption order so the DMA engine serves
    # the earliest consumer first; the fc4 weight copy is issued last (needed last).
    cp_f1 = [pltpu.make_async_copy(f1w_hbm.at[l], f1w_vmem.at[l], sem.at[l])
             for l in range(NUM_LAYERS)]
    cp_f2 = [pltpu.make_async_copy(f2w_hbm.at[l], f2w_vmem.at[l], sem.at[NUM_LAYERS + l])
             for l in range(NUM_LAYERS)]
    cp_w4 = pltpu.make_async_copy(w4_hbm, w4_vmem, sem.at[2 * NUM_LAYERS])
    for l in range(NUM_LAYERS):
        cp_f1[l].start()
        cp_f2[l].start()
    cp_w4.start()

    def bias(row, col, n):
        # Static, 128-lane-aligned slice of the packed parameter array (f32).
        return bias_ref[row:row + 1, col:col + n]

    def dense(h, w_bf16, b_f32, relu):
        # bf16 operands on the MXU, f32 accumulation, f32 bias/ReLU.
        y = jnp.dot(h.astype(jnp.bfloat16), w_bf16,
                    preferred_element_type=jnp.float32) + b_f32
        return jnp.maximum(y, 0.0) if relu else y

    def dense_t(h, w_bf16_t, b_f32, relu):
        # Weight stored lane-dense as (out, in); contract both minor dims (A @ B^T).
        y = lax.dot_general(h.astype(jnp.bfloat16), w_bf16_t,
                            dimension_numbers=(((1,), (1,)), ((), ())),
                            preferred_element_type=jnp.float32) + b_f32
        return jnp.maximum(y, 0.0) if relu else y

    x = x_ref[...]                                           # (M_PAD, INPUT_DIM) f32

    # fc1 / fc2 / fc3 (+ ReLU); dropout is identity at inference.
    x = dense(x, w1_ref[...], bias(0, C_B1, INTERMEDIATE_DIM), True)
    x = dense(x, w2_ref[...], bias(0, C_B2, HIDDEN_DIM), True)
    x = dense(x, w3_ref[...], bias(0, C_B3, D_MODEL), True)

    # Transformer encoder (post-norm).  seq_len == 1 => softmax over the single key == 1,
    # so attention + residual reduces exactly to x @ (I + Wv@Wo) + (bv@Wo + bo), folded host-side.
    for l in range(NUM_LAYERS):
        cbase = C_LAYER0 + l * LAYER_CSTRIDE

        x = _layer_norm(
            dense(x, wattn_ref[l], bias(0, cbase + CL_ATTN_B, D_MODEL), False),
            bias(0, cbase + CL_LN1W, D_MODEL), bias(0, cbase + CL_LN1B, D_MODEL))

        cp_f1[l].wait()       # wait only for this layer's FFN1 weight
        h = dense(x, f1w_vmem[l], bias(ROW_F1B + l, 0, DIM_FEEDFORWARD), True)
        cp_f2[l].wait()       # wait only for this layer's FFN2 weight
        ff = dense_t(h, f2w_vmem[l], bias(0, cbase + CL_F2B, D_MODEL), False)
        x = _layer_norm(x + ff,
                        bias(0, cbase + CL_LN2W, D_MODEL), bias(0, cbase + CL_LN2B, D_MODEL))

    # fc4 (+ ReLU) into the lane-padded output.
    cp_w4.wait()
    out_ref[...] = dense(x, w4_vmem[...], bias(ROW_B4, 0, OUT_DIM_PAD), True)


def init_params(key):
    """Synthetic parameters with shapes matching the PyTorch module.

    Every nn.Linear weight is stored pre-transposed to (in_features, out_features)
    so y = x @ W + b.  Per-encoder-layer params are stacked on a leading axis.
    """
    ks = jax.random.split(key, 16)
    s = 0.05

    def nrm(k, shape):
        return (s * jax.random.normal(k, shape)).astype(jnp.float32)

    L, d, dff = NUM_LAYERS, D_MODEL, DIM_FEEDFORWARD
    return {
        "w1": nrm(ks[0], (INPUT_DIM, INTERMEDIATE_DIM)), "b1": nrm(ks[1], (INTERMEDIATE_DIM,)),
        "w2": nrm(ks[2], (INTERMEDIATE_DIM, HIDDEN_DIM)), "b2": nrm(ks[3], (HIDDEN_DIM,)),
        "w3": nrm(ks[4], (HIDDEN_DIM, d)), "b3": nrm(ks[5], (d,)),
        # self-attention in_proj (q,k,v stacked on the output axis) and out_proj
        "in_proj_w": nrm(ks[6], (L, d, 3 * d)), "in_proj_b": nrm(ks[7], (L, 3 * d)),
        "out_proj_w": nrm(ks[8], (L, d, d)), "out_proj_b": nrm(ks[9], (L, d)),
        "ln1_w": jnp.ones((L, d), jnp.float32), "ln1_b": jnp.zeros((L, d), jnp.float32),
        "ffn1_w": nrm(ks[10], (L, d, dff)), "ffn1_b": nrm(ks[11], (L, dff)),
        "ffn2_w": nrm(ks[12], (L, dff, d)), "ffn2_b": nrm(ks[13], (L, d)),
        "ln2_w": jnp.ones((L, d), jnp.float32), "ln2_b": jnp.zeros((L, d), jnp.float32),
        "w4": nrm(ks[14], (d, OUT_DIM)), "b4": nrm(ks[15], (OUT_DIM,)),
    }


def prepare_kernel_params(p):
    """Host-side prep: fold seq_len==1 attention (+ residual), transpose FFN2 weight to a
    lane-dense layout, pad fc4, pack biases into a sublane-dense (8, 2560) array, cast to bf16.
    Only valid for seq_len == 1 and eval mode (dropout off)."""
    d = D_MODEL

    # attn(x) + x = x @ (I + Wv @ Wo) + (bv @ Wo + bo)   (softmax over 1 key == 1)
    wv = p["in_proj_w"][:, :, 2 * d:3 * d]                       # (L, d, d)
    bv = p["in_proj_b"][:, 2 * d:3 * d]                          # (L, d)
    w_attn = (jnp.eye(d, dtype=jnp.float32)[None]
              + jnp.einsum("lij,ljk->lik", wv, p["out_proj_w"]))  # (L, d, d)
    b_attn = jnp.einsum("lj,ljk->lk", bv, p["out_proj_w"]) + p["out_proj_b"]

    # Pad fc4 to a lane-dense output width (extra columns are exactly zero -> relu(0)=0).
    w4_pad = jnp.zeros((d, OUT_DIM_PAD), jnp.float32).at[:, :OUT_DIM].set(p["w4"])
    b4_pad = jnp.zeros((OUT_DIM_PAD,), jnp.float32).at[:OUT_DIM].set(p["b4"])

    # Pack every small (N,) parameter into an (8, 2560) f32 array (128-aligned segments).
    bias = jnp.zeros((BIAS_ROWS, BIAS_COLS), jnp.float32)
    bias = bias.at[0, C_B1:C_B1 + INTERMEDIATE_DIM].set(p["b1"])
    bias = bias.at[0, C_B2:C_B2 + HIDDEN_DIM].set(p["b2"])
    bias = bias.at[0, C_B3:C_B3 + D_MODEL].set(p["b3"])
    for l in range(NUM_LAYERS):
        cbase = C_LAYER0 + l * LAYER_CSTRIDE
        bias = bias.at[0, cbase + CL_ATTN_B:cbase + CL_ATTN_B + d].set(b_attn[l])
        bias = bias.at[0, cbase + CL_LN1W:cbase + CL_LN1W + d].set(p["ln1_w"][l])
        bias = bias.at[0, cbase + CL_LN1B:cbase + CL_LN1B + d].set(p["ln1_b"][l])
        bias = bias.at[0, cbase + CL_F2B:cbase + CL_F2B + d].set(p["ffn2_b"][l])
        bias = bias.at[0, cbase + CL_LN2W:cbase + CL_LN2W + d].set(p["ln2_w"][l])
        bias = bias.at[0, cbase + CL_LN2B:cbase + CL_LN2B + d].set(p["ln2_b"][l])
        bias = bias.at[ROW_F1B + l, :DIM_FEEDFORWARD].set(p["ffn1_b"][l])
    bias = bias.at[ROW_B4, :].set(b4_pad)

    bf16 = jnp.bfloat16
    return {
        "w1": p["w1"].astype(bf16), "w2": p["w2"].astype(bf16), "w3": p["w3"].astype(bf16),
        "w_attn": w_attn.astype(bf16),
        "f1w": p["ffn1_w"].astype(bf16),                         # (L, d, dff) lane-dense
        "f2w": jnp.swapaxes(p["ffn2_w"], 1, 2).astype(bf16),     # (L, d, dff) lane-dense (out,in)
        "w4": w4_pad.astype(bf16),
        "bias": bias,
    }


@jax.jit
def lin_to_transformer(src, kp):
    """src: (B, C, H, W) float32  ->  (B, 1, GRID_SIZE, GRID_SIZE) float32."""
    b = src.shape[0]
    x = src.reshape(b, -1).astype(jnp.float32)      # same flattening as torch .view(B, -1)
    m_pad = _r8(b)                                  # sublane-dense M
    x = jnp.pad(x, ((0, m_pad - b), (0, 0)))

    vmem = pl.BlockSpec(memory_space=pltpu.MemorySpace.VMEM)
    hbm = pl.BlockSpec(memory_space=pl.ANY)

    out = pl.pallas_call(
        _lin_to_transformer_kernel,
        out_shape=jax.ShapeDtypeStruct((m_pad, OUT_DIM_PAD), jnp.float32),
        in_specs=[vmem, vmem, vmem, vmem, vmem, vmem, hbm, hbm, hbm],
        out_specs=vmem,
        scratch_shapes=[
            pltpu.VMEM((NUM_LAYERS, D_MODEL, DIM_FEEDFORWARD), jnp.bfloat16),  # FFN linear1
            pltpu.VMEM((NUM_LAYERS, D_MODEL, DIM_FEEDFORWARD), jnp.bfloat16),  # FFN linear2 (out,in)
            pltpu.VMEM((D_MODEL, OUT_DIM_PAD), jnp.bfloat16),                  # fc4
            pltpu.SemaphoreType.DMA((2 * NUM_LAYERS + 1,)),
        ],
        compiler_params=pltpu.CompilerParams(vmem_limit_bytes=8 << 20),
    )(x, kp["w1"], kp["w2"], kp["w3"], kp["w_attn"], kp["bias"],
      kp["f1w"], kp["f2w"], kp["w4"])

    out = out[:b, :OUT_DIM]                          # drop batch / lane padding
    return out.reshape(b, 1, GRID_SIZE, GRID_SIZE)


def _reference_forward(src, p):
    """Pure-JAX f32 reference of the PyTorch forward (eval mode)."""
    b = src.shape[0]
    d = D_MODEL
    x = src.reshape(b, -1).astype(jnp.float32)
    x = jax.nn.relu(x @ p["w1"] + p["b1"])
    x = jax.nn.relu(x @ p["w2"] + p["b2"])
    x = jax.nn.relu(x @ p["w3"] + p["b3"])
    for l in range(NUM_LAYERS):
        wv = p["in_proj_w"][l, :, 2 * d:3 * d]
        bv = p["in_proj_b"][l, 2 * d:3 * d]
        # seq_len == 1: softmax over a single key == 1 -> attention == out_proj(v_proj(x)).
        attn = (x @ wv + bv) @ p["out_proj_w"][l] + p["out_proj_b"][l]
        x = _layer_norm(x + attn, p["ln1_w"][l], p["ln1_b"][l])
        h = jax.nn.relu(x @ p["ffn1_w"][l] + p["ffn1_b"][l])
        ff = h @ p["ffn2_w"][l] + p["ffn2_b"][l]
        x = _layer_norm(x + ff, p["ln2_w"][l], p["ln2_b"][l])
    x = jax.nn.relu(x @ p["w4"] + p["b4"])
    return x.reshape(b, 1, GRID_SIZE, GRID_SIZE)


# Note: a v7x two-TensorCore grid split is intentionally NOT used here — at B=2 it would
# duplicate all weight DMA per core; the right throughput lever is batching more rows per call.

if __name__ == "__main__":
    key = jax.random.PRNGKey(0)
    k_x, k_p = jax.random.split(key)
    src = jax.random.normal(k_x, (BATCH, IN_C, IN_H, IN_W), dtype=jnp.float32)

    params = init_params(k_p)
    kparams = prepare_kernel_params(params)

    out = lin_to_transformer(src, kparams)
    jax.block_until_ready(out)

    assert out.shape == (BATCH, 1, GRID_SIZE, GRID_SIZE), out.shape
    assert bool(jnp.all(jnp.isfinite(out)))

    # Loose check vs. the pure-JAX f32 reference (kernel weights are bf16 -> ~1e-2-level error).
    ref = _reference_forward(src, params)
    max_err = float(jnp.max(jnp.abs(out - ref)))
    assert max_err < 0.1, f"max abs error vs f32 reference: {max_err}"

    print("KERNEL_OK")
</pallas_src>

<mosaic_0001>
module attributes {stable_mosaic.version = 11 : i64} {
  func.func @_lin_to_transformer_kernel(%arg0: memref<8x64xf32, #tpu.memory_space<vmem>>, %arg1: memref<64x128xbf16, #tpu.memory_space<vmem>>, %arg2: memref<128x64xbf16, #tpu.memory_space<vmem>>, %arg3: memref<64x32xbf16, #tpu.memory_space<vmem>>, %arg4: memref<2x32x32xbf16, #tpu.memory_space<vmem>>, %arg5: memref<8x2560xf32, #tpu.memory_space<vmem>>, %arg6: memref<2x32x2048xbf16, #tpu.memory_space<any>>, %arg7: memref<2x32x2048xbf16, #tpu.memory_space<any>>, %arg8: memref<32x2560xbf16, #tpu.memory_space<any>>, %arg9: memref<8x2560xf32, #tpu.memory_space<vmem>>, %arg10: memref<2x32x2048xbf16, #tpu.memory_space<vmem>>, %arg11: memref<2x32x2048xbf16, #tpu.memory_space<vmem>>, %arg12: memref<32x2560xbf16, #tpu.memory_space<vmem>>, %arg13: memref<5x!tpu.dma_semaphore, #tpu.memory_space<semaphore_mem>>) attributes {dimension_semantics = [], scalar_prefetch = 0 : i64, scratch_operands = 4 : i64, tpu.core_type = #tpu.core_type<tc>} {
    %c0_i32 = arith.constant 0 : i32
    %c0_i32_0 = arith.constant 0 : i32
    %c0_i32_1 = arith.constant 0 : i32
    %c0_i32_2 = arith.constant 0 : i32
    %c0_i32_3 = arith.constant 0 : i32
    %0 = tpu.memref_slice %arg6[%c0_i32, %c0_i32_2, %c0_i32_3] : memref<2x32x2048xbf16, #tpu.memory_space<any>> -> memref<1x32x2048xbf16, #tpu.memory_space<any>>
    %1 = tpu.memref_squeeze %0 : memref<1x32x2048xbf16, #tpu.memory_space<any>> -> memref<32x2048xbf16, #tpu.memory_space<any>>
    %c0_i32_4 = arith.constant 0 : i32
    %c0_i32_5 = arith.constant 0 : i32
    %2 = tpu.memref_slice %arg10[%c0_i32_0, %c0_i32_4, %c0_i32_5] : memref<2x32x2048xbf16, #tpu.memory_space<vmem>> -> memref<1x32x2048xbf16, #tpu.memory_space<vmem>>
    %3 = tpu.memref_squeeze %2 : memref<1x32x2048xbf16, #tpu.memory_space<vmem>> -> memref<32x2048xbf16, #tpu.memory_space<vmem>>
    %4 = tpu.memref_slice %arg13[%c0_i32_1] : memref<5x!tpu.dma_semaphore, #tpu.memory_space<semaphore_mem>> -> memref<1x!tpu.dma_semaphore, #tpu.memory_space<semaphore_mem>>
    %5 = tpu.memref_squeeze %4 : memref<1x!tpu.dma_semaphore, #tpu.memory_space<semaphore_mem>> -> memref<!tpu.dma_semaphore, #tpu.memory_space<semaphore_mem>>
    tpu.enqueue_dma source(%1 : memref<32x2048xbf16, #tpu.memory_space<any>>) target(%3 : memref<32x2048xbf16, #tpu.memory_space<vmem>>) target_semaphore(%5 : memref<!tpu.dma_semaphore, #tpu.memory_space<semaphore_mem>>)
    %c0_i32_6 = arith.constant 0 : i32
    %c0_i32_7 = arith.constant 0 : i32
    %c2_i32 = arith.constant 2 : i32
    %c0_i32_8 = arith.constant 0 : i32
    %c0_i32_9 = arith.constant 0 : i32
    %6 = tpu.memref_slice %arg7[%c0_i32_6, %c0_i32_8, %c0_i32_9] : memref<2x32x2048xbf16, #tpu.memory_space<any>> -> memref<1x32x2048xbf16, #tpu.memory_space<any>>
    %7 = tpu.memref_squeeze %6 : memref<1x32x2048xbf16, #tpu.memory_space<any>> -> memref<32x2048xbf16, #tpu.memory_space<any>>
    %c0_i32_10 = arith.constant 0 : i32
    %c0_i32_11 = arith.constant 0 : i32
    %8 = tpu.memref_slice %arg11[%c0_i32_7, %c0_i32_10, %c0_i32_11] : memref<2x32x2048xbf16, #tpu.memory_space<vmem>> -> memref<1x32x2048xbf16, #tpu.memory_space<vmem>>
    %9 = tpu.memref_squeeze %8 : memref<1x32x2048xbf16, #tpu.memory_space<vmem>> -> memref<32x2048xbf16, #tpu.memory_space<vmem>>
    %10 = tpu.memref_slice %arg13[%c2_i32] : memref<5x!tpu.dma_semaphore, #tpu.memory_space<semaphore_mem>> -> memref<1x!tpu.dma_semaphore, #tpu.memory_space<semaphore_mem>>
    %11 = tpu.memref_squeeze %10 : memref<1x!tpu.dma_semaphore, #tpu.memory_space<semaphore_mem>> -> memref<!tpu.dma_semaphore, #tpu.memory_space<semaphore_mem>>
    tpu.enqueue_dma source(%7 : memref<32x2048xbf16, #tpu.memory_space<any>>) target(%9 : memref<32x2048xbf16, #tpu.memory_space<vmem>>) target_semaphore(%11 : memref<!tpu.dma_semaphore, #tpu.memory_space<semaphore_mem>>)
    %c1_i32 = arith.constant 1 : i32
    %c1_i32_12 = arith.constant 1 : i32
    %c1_i32_13 = arith.constant 1 : i32
    %c0_i32_14 = arith.constant 0 : i32
    %c0_i32_15 = arith.constant 0 : i32
    %12 = tpu.memref_slice %arg6[%c1_i32, %c0_i32_14, %c0_i32_15] : memref<2x32x2048xbf16, #tpu.memory_space<any>> -> memref<1x32x2048xbf16, #tpu.memory_space<any>>
    %13 = tpu.memref_squeeze %12 : memref<1x32x2048xbf16, #tpu.memory_space<any>> -> memref<32x2048xbf16, #tpu.memory_space<any>>
    %c0_i32_16 = arith.constant 0 : i32
    %c0_i32_17 = arith.constant 0 : i32
    %14 = tpu.memref_slice %arg10[%c1_i32_12, %c0_i32_16, %c0_i32_17] : memref<2x32x2048xbf16, #tpu.memory_space<vmem>> -> memref<1x32x2048xbf16, #tpu.memory_space<vmem>>
    %15 = tpu.memref_squeeze %14 : memref<1x32x2048xbf16, #tpu.memory_space<vmem>> -> memref<32x2048xbf16, #tpu.memory_space<vmem>>
    %16 = tpu.memref_slice %arg13[%c1_i32_13] : memref<5x!tpu.dma_semaphore, #tpu.memory_space<semaphore_mem>> -> memref<1x!tpu.dma_semaphore, #tpu.memory_space<semaphore_mem>>
    %17 = tpu.memref_squeeze %16 : memref<1x!tpu.dma_semaphore, #tpu.memory_space<semaphore_mem>> -> memref<!tpu.dma_semaphore, #tpu.memory_space<semaphore_mem>>
    tpu.enqueue_dma source(%13 : memref<32x2048xbf16, #tpu.memory_space<any>>) target(%15 : memref<32x2048xbf16, #tpu.memory_space<vmem>>) target_semaphore(%17 : memref<!tpu.dma_semaphore, #tpu.memory_space<semaphore_mem>>)
    %c1_i32_18 = arith.constant 1 : i32
    %c1_i32_19 = arith.constant 1 : i32
    %c3_i32 = arith.constant 3 : i32
    %c0_i32_20 = arith.constant 0 : i32
    %c0_i32_21 = arith.constant 0 : i32
    %18 = tpu.memref_slice %arg7[%c1_i32_18, %c0_i32_20, %c0_i32_21] : memref<2x32x2048xbf16, #tpu.memory_space<any>> -> memref<1x32x2048xbf16, #tpu.memory_space<any>>
    %19 = tpu.memref_squeeze %18 : memref<1x32x2048xbf16, #tpu.memory_space<any>> -> memref<32x2048xbf16, #tpu.memory_space<any>>
    %c0_i32_22 = arith.constant 0 : i32
    %c0_i32_23 = arith.constant 0 : i32
    %20 = tpu.memref_slice %arg11[%c1_i32_19, %c0_i32_22, %c0_i32_23] : memref<2x32x2048xbf16, #tpu.memory_space<vmem>> -> memref<1x32x2048xbf16, #tpu.memory_space<vmem>>
    %21 = tpu.memref_squeeze %20 : memref<1x32x2048xbf16, #tpu.memory_space<vmem>> -> memref<32x2048xbf16, #tpu.memory_space<vmem>>
    %22 = tpu.memref_slice %arg13[%c3_i32] : memref<5x!tpu.dma_semaphore, #tpu.memory_space<semaphore_mem>> -> memref<1x!tpu.dma_semaphore, #tpu.memory_space<semaphore_mem>>
    %23 = tpu.memref_squeeze %22 : memref<1x!tpu.dma_semaphore, #tpu.memory_space<semaphore_mem>> -> memref<!tpu.dma_semaphore, #tpu.memory_space<semaphore_mem>>
    tpu.enqueue_dma source(%19 : memref<32x2048xbf16, #tpu.memory_space<any>>) target(%21 : memref<32x2048xbf16, #tpu.memory_space<vmem>>) target_semaphore(%23 : memref<!tpu.dma_semaphore, #tpu.memory_space<semaphore_mem>>)
    %c4_i32 = arith.constant 4 : i32
    %24 = tpu.memref_slice %arg13[%c4_i32] : memref<5x!tpu.dma_semaphore, #tpu.memory_space<semaphore_mem>> -> memref<1x!tpu.dma_semaphore, #tpu.memory_space<semaphore_mem>>
    %25 = tpu.memref_squeeze %24 : memref<1x!tpu.dma_semaphore, #tpu.memory_space<semaphore_mem>> -> memref<!tpu.dma_semaphore, #tpu.memory_space<semaphore_mem>>
    tpu.enqueue_dma source(%arg8 : memref<32x2560xbf16, #tpu.memory_space<any>>) target(%arg12 : memref<32x2560xbf16, #tpu.memory_space<vmem>>) target_semaphore(%25 : memref<!tpu.dma_semaphore, #tpu.memory_space<semaphore_mem>>)
    %c0 = arith.constant 0 : index
    %c0_24 = arith.constant 0 : index
    %26 = vector.load %arg0[%c0, %c0_24] : memref<8x64xf32, #tpu.memory_space<vmem>>, vector<8x64xf32>
    %c0_25 = arith.constant 0 : index
    %c0_26 = arith.constant 0 : index
    %27 = vector.load %arg1[%c0_25, %c0_26] : memref<64x128xbf16, #tpu.memory_space<vmem>>, vector<64x128xbf16>
    %c0_27 = arith.constant 0 : index
    %c0_28 = arith.constant 0 : index
    %28 = vector.load %arg5[%c0_27, %c0_28] : memref<8x2560xf32, #tpu.memory_space<vmem>>, vector<1x128xf32>
    %29 = arith.truncf %26 : vector<8x64xf32> to vector<8x64xbf16>
    %cst = arith.constant dense<0.000000e+00> : vector<8x128xf32>
    %30 = tpu.matmul %29, %27, %cst {dimension_numbers = #tpu.dot_dimension_numbers<[1], [0], [0], [1], [0, 0, 1, 1], [], []>} : vector<8x64xbf16>, vector<64x128xbf16>, vector<8x128xf32> -> vector<8x128xf32>
    %31 = vector.broadcast %28 : vector<1x128xf32> to vector<8x128xf32>
    %32 = arith.addf %30, %31 : vector<8x128xf32>
    %cst_29 = arith.constant 0.000000e+00 : f32
    %33 = vector.broadcast %cst_29 : f32 to vector<8x128xf32>
    %34 = arith.maximumf %32, %33 : vector<8x128xf32>
    %c0_30 = arith.constant 0 : index
    %c0_31 = arith.constant 0 : index
    %35 = vector.load %arg2[%c0_30, %c0_31] : memref<128x64xbf16, #tpu.memory_space<vmem>>, vector<128x64xbf16>
    %c0_32 = arith.constant 0 : index
    %c128 = arith.constant 128 : index
    %36 = vector.load %arg5[%c0_32, %c128] : memref<8x2560xf32, #tpu.memory_space<vmem>>, vector<1x64xf32>
    %37 = arith.truncf %34 : vector<8x128xf32> to vector<8x128xbf16>
    %cst_33 = arith.constant dense<0.000000e+00> : vector<8x64xf32>
    %38 = tpu.matmul %37, %35, %cst_33 {dimension_numbers = #tpu.dot_dimension_numbers<[1], [0], [0], [1], [0, 0, 1, 1], [], []>} : vector<8x128xbf16>, vector<128x64xbf16>, vector<8x64xf32> -> vector<8x64xf32>
    %39 = vector.broadcast %36 : vector<1x64xf32> to vector<8x64xf32>
    %40 = arith.addf %38, %39 : vector<8x64xf32>
    %cst_34 = arith.constant 0.000000e+00 : f32
    %41 = vector.broadcast %cst_34 : f32 to vector<8x64xf32>
    %42 = arith.maximumf %40, %41 : vector<8x64xf32>
    %c0_35 = arith.constant 0 : index
    %c0_36 = arith.constant 0 : index
    %43 = vector.load %arg3[%c0_35, %c0_36] : memref<64x32xbf16, #tpu.memory_space<vmem>>, vector<64x32xbf16>
    %c0_37 = arith.constant 0 : index
    %c256 = arith.constant 256 : index
    %44 = vector.load %arg5[%c0_37, %c256] : memref<8x2560xf32, #tpu.memory_space<vmem>>, vector<1x32xf32>
    %45 = arith.truncf %42 : vector<8x64xf32> to vector<8x64xbf16>
    %cst_38 = arith.constant dense<0.000000e+00> : vector<8x32xf32>
    %46 = tpu.matmul %45, %43, %cst_38 {dimension_numbers = #tpu.dot_dimension_numbers<[1], [0], [0], [1], [0, 0, 1, 1], [], []>} : vector<8x64xbf16>, vector<64x32xbf16>, vector<8x32xf32> -> vector<8x32xf32>
    %47 = vector.broadcast %44 : vector<1x32xf32> to vector<8x32xf32>
    %48 = arith.addf %46, %47 : vector<8x32xf32>
    %cst_39 = arith.constant 0.000000e+00 : f32
    %49 = vector.broadcast %cst_39 : f32 to vector<8x32xf32>
    %50 = arith.maximumf %48, %49 : vector<8x32xf32>
    %c0_40 = arith.constant 0 : index
    %c0_41 = arith.constant 0 : index
    %c0_42 = arith.constant 0 : index
    %51 = vector.load %arg4[%c0_40, %c0_41, %c0_42] : memref<2x32x32xbf16, #tpu.memory_space<vmem>>, vector<1x32x32xbf16>
    %52 = vector.shape_cast %51 : vector<1x32x32xbf16> to vector<32x32xbf16>
    %c0_43 = arith.constant 0 : index
    %c384 = arith.constant 384 : index
    %53 = vector.load %arg5[%c0_43, %c384] : memref<8x2560xf32, #tpu.memory_space<vmem>>, vector<1x32xf32>
    %54 = arith.truncf %50 : vector<8x32xf32> to vector<8x32xbf16>
    %cst_44 = arith.constant dense<0.000000e+00> : vector<8x32xf32>
    %55 = tpu.matmul %54, %52, %cst_44 {dimension_numbers = #tpu.dot_dimension_numbers<[1], [0], [0], [1], [0, 0, 1, 1], [], []>} : vector<8x32xbf16>, vector<32x32xbf16>, vector<8x32xf32> -> vector<8x32xf32>
    %56 = vector.broadcast %53 : vector<1x32xf32> to vector<8x32xf32>
    %57 = arith.addf %55, %56 : vector<8x32xf32>
    %c0_45 = arith.constant 0 : index
    %c512 = arith.constant 512 : index
    %58 = vector.load %arg5[%c0_45, %c512] : memref<8x2560xf32, #tpu.memory_space<vmem>>, vector<1x32xf32>
    %c0_46 = arith.constant 0 : index
    %c640 = arith.constant 640 : index
    %59 = vector.load %arg5[%c0_46, %c640] : memref<8x2560xf32, #tpu.memory_space<vmem>>, vector<1x32xf32>
    %cst_47 = arith.constant dense<0.000000e+00> : vector<8xf32>
    %60 = vector.multi_reduction <add>, %57, %cst_47 [1] : vector<8x32xf32> to vector<8xf32>
    %61 = vector.shape_cast %60 : vector<8xf32> to vector<8x1xf32>
    %cst_48 = arith.constant 3.200000e+01 : f32
    %62 = vector.broadcast %cst_48 : f32 to vector<8x1xf32>
    %63 = arith.divf %61, %62 : vector<8x1xf32>
    %64 = vector.broadcast %63 : vector<8x1xf32> to vector<8x32xf32>
    %65 = arith.subf %57, %64 : vector<8x32xf32>
    %66 = arith.mulf %65, %65 : vector<8x32xf32>
    %cst_49 = arith.constant dense<0.000000e+00> : vector<8xf32>
    %67 = vector.multi_reduction <add>, %66, %cst_49 [1] : vector<8x32xf32> to vector<8xf32>
    %68 = vector.shape_cast %67 : vector<8xf32> to vector<8x1xf32>
    %cst_50 = arith.constant 3.200000e+01 : f32
    %69 = vector.broadcast %cst_50 : f32 to vector<8x1xf32>
    %70 = arith.divf %68, %69 : vector<8x1xf32>
    %cst_51 = arith.constant 9.99999974E-6 : f32
    %71 = vector.broadcast %cst_51 : f32 to vector<8x1xf32>
    %72 = arith.addf %70, %71 : vector<8x1xf32>
    %73 = math.rsqrt %72 : vector<8x1xf32>
    %74 = vector.broadcast %73 : vector<8x1xf32> to vector<8x32xf32>
    %75 = arith.mulf %65, %74 : vector<8x32xf32>
    %76 = vector.broadcast %58 : vector<1x32xf32> to vector<8x32xf32>
    %77 = arith.mulf %75, %76 : vector<8x32xf32>
    %78 = vector.broadcast %59 : vector<1x32xf32> to vector<8x32xf32>
    %79 = arith.addf %77, %78 : vector<8x32xf32>
    %c0_i32_52 = arith.constant 0 : i32
    %c0_i32_53 = arith.constant 0 : i32
    %c0_i32_54 = arith.constant 0 : i32
    %c0_i32_55 = arith.constant 0 : i32
    %c0_i32_56 = arith.constant 0 : i32
    %80 = tpu.memref_slice %arg6[%c0_i32_52, %c0_i32_55, %c0_i32_56] : memref<2x32x2048xbf16, #tpu.memory_space<any>> -> memref<1x32x2048xbf16, #tpu.memory_space<any>>
    %81 = tpu.memref_squeeze %80 : memref<1x32x2048xbf16, #tpu.memory_space<any>> -> memref<32x2048xbf16, #tpu.memory_space<any>>
    %c0_i32_57 = arith.constant 0 : i32
    %c0_i32_58 = arith.constant 0 : i32
    %82 = tpu.memref_slice %arg10[%c0_i32_53, %c0_i32_57, %c0_i32_58] : memref<2x32x2048xbf16, #tpu.memory_space<vmem>> -> memref<1x32x2048xbf16, #tpu.memory_space<vmem>>
    %83 = tpu.memref_squeeze %82 : memref<1x32x2048xbf16, #tpu.memory_space<vmem>> -> memref<32x2048xbf16, #tpu.memory_space<vmem>>
    %84 = tpu.memref_slice %arg13[%c0_i32_54] : memref<5x!tpu.dma_semaphore, #tpu.memory_space<semaphore_mem>> -> memref<1x!tpu.dma_semaphore, #tpu.memory_space<semaphore_mem>>
    %85 = tpu.memref_squeeze %84 : memref<1x!tpu.dma_semaphore, #tpu.memory_space<semaphore_mem>> -> memref<!tpu.dma_semaphore, #tpu.memory_space<semaphore_mem>>
    tpu.wait_dma2 semaphore(%85 : memref<!tpu.dma_semaphore, #tpu.memory_space<semaphore_mem>>) src(%81 : memref<32x2048xbf16, #tpu.memory_space<any>>) dst(%83 : memref<32x2048xbf16, #tpu.memory_space<vmem>>)
    %c0_59 = arith.constant 0 : index
    %c0_60 = arith.constant 0 : index
    %c0_61 = arith.constant 0 : index
    %86 = vector.load %arg10[%c0_59, %c0_60, %c0_61] : memref<2x32x2048xbf16, #tpu.memory_space<vmem>>, vector<1x32x2048xbf16>
    %87 = vector.shape_cast %86 : vector<1x32x2048xbf16> to vector<32x2048xbf16>
    %c1 = arith.constant 1 : index
    %c0_62 = arith.constant 0 : index
    %88 = vector.load %arg5[%c1, %c0_62] : memref<8x2560xf32, #tpu.memory_space<vmem>>, vector<1x2048xf32>
    %89 = arith.truncf %79 : vector<8x32xf32> to vector<8x32xbf16>
    %cst_63 = arith.constant dense<0.000000e+00> : vector<8x2048xf32>
    %90 = tpu.matmul %89, %87, %cst_63 {dimension_numbers = #tpu.dot_dimension_numbers<[1], [0], [0], [1], [0, 0, 1, 1], [], []>} : vector<8x32xbf16>, vector<32x2048xbf16>, vector<8x2048xf32> -> vector<8x2048xf32>
    %91 = vector.broadcast %88 : vector<1x2048xf32> to vector<8x2048xf32>
    %92 = arith.addf %90, %91 : vector<8x2048xf32>
    %cst_64 = arith.constant 0.000000e+00 : f32
    %93 = vector.broadcast %cst_64 : f32 to vector<8x2048xf32>
    %94 = arith.maximumf %92, %93 : vector<8x2048xf32>
    %c0_i32_65 = arith.constant 0 : i32
    %c0_i32_66 = arith.constant 0 : i32
    %c2_i32_67 = arith.constant 2 : i32
    %c0_i32_68 = arith.constant 0 : i32
    %c0_i32_69 = arith.constant 0 : i32
    %95 = tpu.memref_slice %arg7[%c0_i32_65, %c0_i32_68, %c0_i32_69] : memref<2x32x2048xbf16, #tpu.memory_space<any>> -> memref<1x32x2048xbf16, #tpu.memory_space<any>>
    %96 = tpu.memref_squeeze %95 : memref<1x32x2048xbf16, #tpu.memory_space<any>> -> memref<32x2048xbf16, #tpu.memory_space<any>>
    %c0_i32_70 = arith.constant 0 : i32
    %c0_i32_71 = arith.constant 0 : i32
    %97 = tpu.memref_slice %arg11[%c0_i32_66, %c0_i32_70, %c0_i32_71] : memref<2x32x2048xbf16, #tpu.memory_space<vmem>> -> memref<1x32x2048xbf16, #tpu.memory_space<vmem>>
    %98 = tpu.memref_squeeze %97 : memref<1x32x2048xbf16, #tpu.memory_space<vmem>> -> memref<32x2048xbf16, #tpu.memory_space<vmem>>
    %99 = tpu.memref_slice %arg13[%c2_i32_67] : memref<5x!tpu.dma_semaphore, #tpu.memory_space<semaphore_mem>> -> memref<1x!tpu.dma_semaphore, #tpu.memory_space<semaphore_mem>>
    %100 = tpu.memref_squeeze %99 : memref<1x!tpu.dma_semaphore, #tpu.memory_space<semaphore_mem>> -> memref<!tpu.dma_semaphore, #tpu.memory_space<semaphore_mem>>
    tpu.wait_dma2 semaphore(%100 : memref<!tpu.dma_semaphore, #tpu.memory_space<semaphore_mem>>) src(%96 : memref<32x2048xbf16, #tpu.memory_space<any>>) dst(%98 : memref<32x2048xbf16, #tpu.memory_space<vmem>>)
    %c0_72 = arith.constant 0 : index
    %c0_73 = arith.constant 0 : index
    %c0_74 = arith.constant 0 : index
    %101 = vector.load %arg11[%c0_72, %c0_73, %c0_74] : memref<2x32x2048xbf16, #tpu.memory_space<vmem>>, vector<1x32x2048xbf16>
    %102 = vector.shape_cast %101 : vector<1x32x2048xbf16> to vector<32x2048xbf16>
    %c0_75 = arith.constant 0 : index
    %c768 = arith.constant 768 : index
    %103 = vector.load %arg5[%c0_75, %c768] : memref<8x2560xf32, #tpu.memory_space<vmem>>, vector<1x32xf32>
    %104 = arith.truncf %94 : vector<8x2048xf32> to vector<8x2048xbf16>
    %cst_76 = arith.constant dense<0.000000e+00> : vector<8x32xf32>
    %105 = tpu.matmul %104, %102, %cst_76 {dimension_numbers = #tpu.dot_dimension_numbers<[1], [1], [0], [0], [0, 0, 1, 0], [], []>} : vector<8x2048xbf16>, vector<32x2048xbf16>, vector<8x32xf32> -> vector<8x32xf32>
    %106 = vector.broadcast %103 : vector<1x32xf32> to vector<8x32xf32>
    %107 = arith.addf %105, %106 : vector<8x32xf32>
    %108 = arith.addf %79, %107 : vector<8x32xf32>
    %c0_77 = arith.constant 0 : index
    %c896 = arith.constant 896 : index
    %109 = vector.load %arg5[%c0_77, %c896] : memref<8x2560xf32, #tpu.memory_space<vmem>>, vector<1x32xf32>
    %c0_78 = arith.constant 0 : index
    %c1024 = arith.constant 1024 : index
    %110 = vector.load %arg5[%c0_78, %c1024] : memref<8x2560xf32, #tpu.memory_space<vmem>>, vector<1x32xf32>
    %cst_79 = arith.constant dense<0.000000e+00> : vector<8xf32>
    %111 = vector.multi_reduction <add>, %108, %cst_79 [1] : vector<8x32xf32> to vector<8xf32>
    %112 = vector.shape_cast %111 : vector<8xf32> to vector<8x1xf32>
    %cst_80 = arith.constant 3.200000e+01 : f32
    %113 = vector.broadcast %cst_80 : f32 to vector<8x1xf32>
    %114 = arith.divf %112, %113 : vector<8x1xf32>
    %115 = vector.broadcast %114 : vector<8x1xf32> to vector<8x32xf32>
    %116 = arith.subf %108, %115 : vector<8x32xf32>
    %117 = arith.mulf %116, %116 : vector<8x32xf32>
    %cst_81 = arith.constant dense<0.000000e+00> : vector<8xf32>
    %118 = vector.multi_reduction <add>, %117, %cst_81 [1] : vector<8x32xf32> to vector<8xf32>
    %119 = vector.shape_cast %118 : vector<8xf32> to vector<8x1xf32>
    %cst_82 = arith.constant 3.200000e+01 : f32
    %120 = vector.broadcast %cst_82 : f32 to vector<8x1xf32>
    %121 = arith.divf %119, %120 : vector<8x1xf32>
    %cst_83 = arith.constant 9.99999974E-6 : f32
    %122 = vector.broadcast %cst_83 : f32 to vector<8x1xf32>
    %123 = arith.addf %121, %122 : vector<8x1xf32>
    %124 = math.rsqrt %123 : vector<8x1xf32>
    %125 = vector.broadcast %124 : vector<8x1xf32> to vector<8x32xf32>
    %126 = arith.mulf %116, %125 : vector<8x32xf32>
    %127 = vector.broadcast %109 : vector<1x32xf32> to vector<8x32xf32>
    %128 = arith.mulf %126, %127 : vector<8x32xf32>
    %129 = vector.broadcast %110 : vector<1x32xf32> to vector<8x32xf32>
    %130 = arith.addf %128, %129 : vector<8x32xf32>
    %c1_84 = arith.constant 1 : index
    %c0_85 = arith.constant 0 : index
    %c0_86 = arith.constant 0 : index
    %131 = vector.load %arg4[%c1_84, %c0_85, %c0_86] : memref<2x32x32xbf16, #tpu.memory_space<vmem>>, vector<1x32x32xbf16>
    %132 = vector.shape_cast %131 : vector<1x32x32xbf16> to vector<32x32xbf16>
    %c0_87 = arith.constant 0 : index
    %c1152 = arith.constant 1152 : index
    %133 = vector.load %arg5[%c0_87, %c1152] : memref<8x2560xf32, #tpu.memory_space<vmem>>, vector<1x32xf32>
    %134 = arith.truncf %130 : vector<8x32xf32> to vector<8x32xbf16>
    %cst_88 = arith.constant dense<0.000000e+00> : vector<8x32xf32>
    %135 = tpu.matmul %134, %132, %cst_88 {dimension_numbers = #tpu.dot_dimension_numbers<[1], [0], [0], [1], [0, 0, 1, 1], [], []>} : vector<8x32xbf16>, vector<32x32xbf16>, vector<8x32xf32> -> vector<8x32xf32>
    %136 = vector.broadcast %133 : vector<1x32xf32> to vector<8x32xf32>
    %137 = arith.addf %135, %136 : vector<8x32xf32>
    %c0_89 = arith.constant 0 : index
    %c1280 = arith.constant 1280 : index
    %138 = vector.load %arg5[%c0_89, %c1280] : memref<8x2560xf32, #tpu.memory_space<vmem>>, vector<1x32xf32>
    %c0_90 = arith.constant 0 : index
    %c1408 = arith.constant 1408 : index
    %139 = vector.load %arg5[%c0_90, %c1408] : memref<8x2560xf32, #tpu.memory_space<vmem>>, vector<1x32xf32>
    %cst_91 = arith.constant dense<0.000000e+00> : vector<8xf32>
    %140 = vector.multi_reduction <add>, %137, %cst_91 [1] : vector<8x32xf32> to vector<8xf32>
    %141 = vector.shape_cast %140 : vector<8xf32> to vector<8x1xf32>
    %cst_92 = arith.constant 3.200000e+01 : f32
    %142 = vector.broadcast %cst_92 : f32 to vector<8x1xf32>
    %143 = arith.divf %141, %142 : vector<8x1xf32>
    %144 = vector.broadcast %143 : vector<8x1xf32> to vector<8x32xf32>
    %145 = arith.subf %137, %144 : vector<8x32xf32>
    %146 = arith.mulf %145, %145 : vector<8x32xf32>
    %cst_93 = arith.constant dense<0.000000e+00> : vector<8xf32>
    %147 = vector.multi_reduction <add>, %146, %cst_93 [1] : vector<8x32xf32> to vector<8xf32>
    %148 = vector.shape_cast %147 : vector<8xf32> to vector<8x1xf32>
    %cst_94 = arith.constant 3.200000e+01 : f32
    %149 = vector.broadcast %cst_94 : f32 to vector<8x1xf32>
    %150 = arith.divf %148, %149 : vector<8x1xf32>
    %cst_95 = arith.constant 9.99999974E-6 : f32
    %151 = vector.broadcast %cst_95 : f32 to vector<8x1xf32>
    %152 = arith.addf %150, %151 : vector<8x1xf32>
    %153 = math.rsqrt %152 : vector<8x1xf32>
    %154 = vector.broadcast %153 : vector<8x1xf32> to vector<8x32xf32>
    %155 = arith.mulf %145, %154 : vector<8x32xf32>
    %156 = vector.broadcast %138 : vector<1x32xf32> to vector<8x32xf32>
    %157 = arith.mulf %155, %156 : vector<8x32xf32>
    %158 = vector.broadcast %139 : vector<1x32xf32> to vector<8x32xf32>
    %159 = arith.addf %157, %158 : vector<8x32xf32>
    %c1_i32_96 = arith.constant 1 : i32
    %c1_i32_97 = arith.constant 1 : i32
    %c1_i32_98 = arith.constant 1 : i32
    %c0_i32_99 = arith.constant 0 : i32
    %c0_i32_100 = arith.constant 0 : i32
    %160 = tpu.memref_slice %arg6[%c1_i32_96, %c0_i32_99, %c0_i32_100] : memref<2x32x2048xbf16, #tpu.memory_space<any>> -> memref<1x32x2048xbf16, #tpu.memory_space<any>>
    %161 = tpu.memref_squeeze %160 : memref<1x32x2048xbf16, #tpu.memory_space<any>> -> memref<32x2048xbf16, #tpu.memory_space<any>>
    %c0_i32_101 = arith.constant 0 : i32
    %c0_i32_102 = arith.constant 0 : i32
    %162 = tpu.memref_slice %arg10[%c1_i32_97, %c0_i32_101, %c0_i32_102] : memref<2x32x2048xbf16, #tpu.memory_space<vmem>> -> memref<1x32x2048xbf16, #tpu.memory_space<vmem>>
    %163 = tpu.memref_squeeze %162 : memref<1x32x2048xbf16, #tpu.memory_space<vmem>> -> memref<32x2048xbf16, #tpu.memory_space<vmem>>
    %164 = tpu.memref_slice %arg13[%c1_i32_98] : memref<5x!tpu.dma_semaphore, #tpu.memory_space<semaphore_mem>> -> memref<1x!tpu.dma_semaphore, #tpu.memory_space<semaphore_mem>>
    %165 = tpu.memref_squeeze %164 : memref<1x!tpu.dma_semaphore, #tpu.memory_space<semaphore_mem>> -> memref<!tpu.dma_semaphore, #tpu.memory_space<semaphore_mem>>
    tpu.wait_dma2 semaphore(%165 : memref<!tpu.dma_semaphore, #tpu.memory_space<semaphore_mem>>) src(%161 : memref<32x2048xbf16, #tpu.memory_space<any>>) dst(%163 : memref<32x2048xbf16, #tpu.memory_space<vmem>>)
    %c1_103 = arith.constant 1 : index
    %c0_104 = arith.constant 0 : index
    %c0_105 = arith.constant 0 : index
    %166 = vector.load %arg10[%c1_103, %c0_104, %c0_105] : memref<2x32x2048xbf16, #tpu.memory_space<vmem>>, vector<1x32x2048xbf16>
    %167 = vector.shape_cast %166 : vector<1x32x2048xbf16> to vector<32x2048xbf16>
    %c2 = arith.constant 2 : index
    %c0_106 = arith.constant 0 : index
    %168 = vector.load %arg5[%c2, %c0_106] : memref<8x2560xf32, #tpu.memory_space<vmem>>, vector<1x2048xf32>
    %169 = arith.truncf %159 : vector<8x32xf32> to vector<8x32xbf16>
    %cst_107 = arith.constant dense<0.000000e+00> : vector<8x2048xf32>
    %170 = tpu.matmul %169, %167, %cst_107 {dimension_numbers = #tpu.dot_dimension_numbers<[1], [0], [0], [1], [0, 0, 1, 1], [], []>} : vector<8x32xbf16>, vector<32x2048xbf16>, vector<8x2048xf32> -> vector<8x2048xf32>
    %171 = vector.broadcast %168 : vector<1x2048xf32> to vector<8x2048xf32>
    %172 = arith.addf %170, %171 : vector<8x2048xf32>
    %cst_108 = arith.constant 0.000000e+00 : f32
    %173 = vector.broadcast %cst_108 : f32 to vector<8x2048xf32>
    %174 = arith.maximumf %172, %173 : vector<8x2048xf32>
    %c1_i32_109 = arith.constant 1 : i32
    %c1_i32_110 = arith.constant 1 : i32
    %c3_i32_111 = arith.constant 3 : i32
    %c0_i32_112 = arith.constant 0 : i32
    %c0_i32_113 = arith.constant 0 : i32
    %175 = tpu.memref_slice %arg7[%c1_i32_109, %c0_i32_112, %c0_i32_113] : memref<2x32x2048xbf16, #tpu.memory_space<any>> -> memref<1x32x2048xbf16, #tpu.memory_space<any>>
    %176 = tpu.memref_squeeze %175 : memref<1x32x2048xbf16, #tpu.memory_space<any>> -> memref<32x2048xbf16, #tpu.memory_space<any>>
    %c0_i32_114 = arith.constant 0 : i32
    %c0_i32_115 = arith.constant 0 : i32
    %177 = tpu.memref_slice %arg11[%c1_i32_110, %c0_i32_114, %c0_i32_115] : memref<2x32x2048xbf16, #tpu.memory_space<vmem>> -> memref<1x32x2048xbf16, #tpu.memory_space<vmem>>
    %178 = tpu.memref_squeeze %177 : memref<1x32x2048xbf16, #tpu.memory_space<vmem>> -> memref<32x2048xbf16, #tpu.memory_space<vmem>>
    %179 = tpu.memref_slice %arg13[%c3_i32_111] : memref<5x!tpu.dma_semaphore, #tpu.memory_space<semaphore_mem>> -> memref<1x!tpu.dma_semaphore, #tpu.memory_space<semaphore_mem>>
    %180 = tpu.memref_squeeze %179 : memref<1x!tpu.dma_semaphore, #tpu.memory_space<semaphore_mem>> -> memref<!tpu.dma_semaphore, #tpu.memory_space<semaphore_mem>>
    tpu.wait_dma2 semaphore(%180 : memref<!tpu.dma_semaphore, #tpu.memory_space<semaphore_mem>>) src(%176 : memref<32x2048xbf16, #tpu.memory_space<any>>) dst(%178 : memref<32x2048xbf16, #tpu.memory_space<vmem>>)
    %c1_116 = arith.constant 1 : index
    %c0_117 = arith.constant 0 : index
    %c0_118 = arith.constant 0 : index
    %181 = vector.load %arg11[%c1_116, %c0_117, %c0_118] : memref<2x32x2048xbf16, #tpu.memory_space<vmem>>, vector<1x32x2048xbf16>
    %182 = vector.shape_cast %181 : vector<1x32x2048xbf16> to vector<32x2048xbf16>
    %c0_119 = arith.constant 0 : index
    %c1536 = arith.constant 1536 : index
    %183 = vector.load %arg5[%c0_119, %c1536] : memref<8x2560xf32, #tpu.memory_space<vmem>>, vector<1x32xf32>
    %184 = arith.truncf %174 : vector<8x2048xf32> to vector<8x2048xbf16>
    %cst_120 = arith.constant dense<0.000000e+00> : vector<8x32xf32>
    %185 = tpu.matmul %184, %182, %cst_120 {dimension_numbers = #tpu.dot_dimension_numbers<[1], [1], [0], [0], [0, 0, 1, 0], [], []>} : vector<8x2048xbf16>, vector<32x2048xbf16>, vector<8x32xf32> -> vector<8x32xf32>
    %186 = vector.broadcast %183 : vector<1x32xf32> to vector<8x32xf32>
    %187 = arith.addf %185, %186 : vector<8x32xf32>
    %188 = arith.addf %159, %187 : vector<8x32xf32>
    %c0_121 = arith.constant 0 : index
    %c1664 = arith.constant 1664 : index
    %189 = vector.load %arg5[%c0_121, %c1664] : memref<8x2560xf32, #tpu.memory_space<vmem>>, vector<1x32xf32>
    %c0_122 = arith.constant 0 : index
    %c1792 = arith.constant 1792 : index
    %190 = vector.load %arg5[%c0_122, %c1792] : memref<8x2560xf32, #tpu.memory_space<vmem>>, vector<1x32xf32>
    %cst_123 = arith.constant dense<0.000000e+00> : vector<8xf32>
    %191 = vector.multi_reduction <add>, %188, %cst_123 [1] : vector<8x32xf32> to vector<8xf32>
    %192 = vector.shape_cast %191 : vector<8xf32> to vector<8x1xf32>
    %cst_124 = arith.constant 3.200000e+01 : f32
    %193 = vector.broadcast %cst_124 : f32 to vector<8x1xf32>
    %194 = arith.divf %192, %193 : vector<8x1xf32>
    %195 = vector.broadcast %194 : vector<8x1xf32> to vector<8x32xf32>
    %196 = arith.subf %188, %195 : vector<8x32xf32>
    %197 = arith.mulf %196, %196 : vector<8x32xf32>
    %cst_125 = arith.constant dense<0.000000e+00> : vector<8xf32>
    %198 = vector.multi_reduction <add>, %197, %cst_125 [1] : vector<8x32xf32> to vector<8xf32>
    %199 = vector.shape_cast %198 : vector<8xf32> to vector<8x1xf32>
    %cst_126 = arith.constant 3.200000e+01 : f32
    %200 = vector.broadcast %cst_126 : f32 to vector<8x1xf32>
    %201 = arith.divf %199, %200 : vector<8x1xf32>
    %cst_127 = arith.constant 9.99999974E-6 : f32
    %202 = vector.broadcast %cst_127 : f32 to vector<8x1xf32>
    %203 = arith.addf %201, %202 : vector<8x1xf32>
    %204 = math.rsqrt %203 : vector<8x1xf32>
    %205 = vector.broadcast %204 : vector<8x1xf32> to vector<8x32xf32>
    %206 = arith.mulf %196, %205 : vector<8x32xf32>
    %207 = vector.broadcast %189 : vector<1x32xf32> to vector<8x32xf32>
    %208 = arith.mulf %206, %207 : vector<8x32xf32>
    %209 = vector.broadcast %190 : vector<1x32xf32> to vector<8x32xf32>
    %210 = arith.addf %208, %209 : vector<8x32xf32>
    %c4_i32_128 = arith.constant 4 : i32
    %211 = tpu.memref_slice %arg13[%c4_i32_128] : memref<5x!tpu.dma_semaphore, #tpu.memory_space<semaphore_mem>> -> memref<1x!tpu.dma_semaphore, #tpu.memory_space<semaphore_mem>>
    %212 = tpu.memref_squeeze %211 : memref<1x!tpu.dma_semaphore, #tpu.memory_space<semaphore_mem>> -> memref<!tpu.dma_semaphore, #tpu.memory_space<semaphore_mem>>
    tpu.wait_dma2 semaphore(%212 : memref<!tpu.dma_semaphore, #tpu.memory_space<semaphore_mem>>) src(%arg8 : memref<32x2560xbf16, #tpu.memory_space<any>>) dst(%arg12 : memref<32x2560xbf16, #tpu.memory_space<vmem>>)
    %c0_129 = arith.constant 0 : index
    %c0_130 = arith.constant 0 : index
    %213 = vector.load %arg12[%c0_129, %c0_130] : memref<32x2560xbf16, #tpu.memory_space<vmem>>, vector<32x2560xbf16>
    %c3 = arith.constant 3 : index
    %c0_131 = arith.constant 0 : index
    %214 = vector.load %arg5[%c3, %c0_131] : memref<8x2560xf32, #tpu.memory_space<vmem>>, vector<1x2560xf32>
    %215 = arith.truncf %210 : vector<8x32xf32> to vector<8x32xbf16>
    %cst_132 = arith.constant dense<0.000000e+00> : vector<8x2560xf32>
    %216 = tpu.matmul %215, %213, %cst_132 {dimension_numbers = #tpu.dot_dimension_numbers<[1], [0], [0], [1], [0, 0, 1, 1], [], []>} : vector<8x32xbf16>, vector<32x2560xbf16>, vector<8x2560xf32> -> vector<8x2560xf32>
    %217 = vector.broadcast %214 : vector<1x2560xf32> to vector<8x2560xf32>
    %218 = arith.addf %216, %217 : vector<8x2560xf32>
    %cst_133 = arith.constant 0.000000e+00 : f32
    %219 = vector.broadcast %cst_133 : f32 to vector<8x2560xf32>
    %220 = arith.maximumf %218, %219 : vector<8x2560xf32>
    %c0_134 = arith.constant 0 : index
    %c0_135 = arith.constant 0 : index
    %221 = vector.load %arg9[%c0_134, %c0_135] : memref<8x2560xf32, #tpu.memory_space<vmem>>, vector<8x2560xf32>
    tpu.vector_store %arg9[%c0_134, %c0_135], %220 {strides = array<i32>} : memref<8x2560xf32, #tpu.memory_space<vmem>>, vector<8x2560xf32>,
    return
  }
}

</mosaic_0001>

<bundles_post_ra>
// kernel: lin_to_transformer.1
= control target key start
LH: loop header
LB: loop body
LE: loop exit
PB: predicated region body
PF: predicated region fallthrough
CT: control target
= control target key end

     0   :  { %14 = vsyncpa [#allocation7], 0  ;;  %s3275_s30 = smov [#allocation6]   ;;  %s4003_s0 = inlined_call_operand.vmem [shape: f32[8,64], index: 0, kind: input, shape index: {}]   ;;  %s4004_s1 = inlined_call_operand.hbm [shape: bf16[64,128], index: 1, kind: input, shape index: {}]   ;;  %s4005_s2 = inlined_call_operand.vmem [shape: bf16[128,64], index: 2, kind: input, shape index: {}]   ;;  %s4006_s3 = inlined_call_operand.vmem [shape: bf16[64,32], index: 3, kind: input, shape index: {}]   ;;  %s4007_s4 = inlined_call_operand.vmem [shape: bf16[2,32,32], index: 4, kind: input, shape index: {}]   ;;  %s4008_s5 = inlined_call_operand.vmem [shape: f32[8,2560], index: 5, kind: input, shape index: {}]   ;;  %s4009_s6 = inlined_call_operand.hbm [shape: bf16[2,32,2048], index: 6, kind: input, shape index: {}]   ;;  %s4010_s7 = inlined_call_operand.hbm [shape: bf16[2,32,2048], index: 7, kind: input, shape index: {}]   ;;  %s4011_s8 = inlined_call_operand.hbm [shape: bf16[32,2560], index: 8, kind: input, shape index: {}]   ;;  %s4012_s9 = inlined_call_operand.vmem [shape: f32[8,2560], index: 9, kind: output, shape index: {}]  }
   0x1   :  { %s22_s10 = sshll.u32 %s3275_s30, 4  ;;  %s3241_s13 = scalar_lea.hbm %s4004_s1, 512  ;;  %s23_s10 = int_to_ptr.vmem [resolvable:$true] %s22_s10 }
   0x2   :  { %p3242_p0 = scmp.ne.s32.totalorder %s4004_s1, %s3241_s13  ;;  %p3245_p1 = scmp.lt.u32.totalorder %s3241_s13, %s4004_s1 }
   0x4   :  { %p3247_p2 = pnand %p3245_p1, %p3242_p0 }
   0x6   :  { %3250 = shalt.err (!%p3247_p2)
}
   0x7   :  { %s3251_s18 = scalar_lea.vmem %s23_s10, 512  ;;  %p3256_p4 = scmp.lt.s32.totalorder %s23_s10, %s23_s10 }
   0x8   :  { %p3252_p3 = scmp.ne.s32.totalorder %s23_s10, %s3251_s18  ;;  %p3257_p5 = scmp.lt.s32.totalorder %s3251_s18, %s3251_s18 }
   0xa   :  { %p3258_p6 = por %p3257_p5, %p3256_p4 }
   0xc   :  { %p3259_p7 = pnand %p3258_p6, %p3252_p3 }
   0xe   :  { %3262 = shalt.err (!%p3259_p7)
}
   0xf   :  { %s3276_s19 = smov 64   ;;  %s3277_s20 = smov 4  }
  0x10   :  { %28 = dma.hbm_to_vmem [thread:$0]  %s4004_s1, 512, %s23_s10, [#allocation7], %s3276_s19, %s3276_s19, %s3277_s20  }
  0x11   :  { %3263 = dma.done.wait [#allocation7], 512  }
  0x12   :  { %3264 = vsyncadd [#allocation7], 4294966784  ;;  %s45_s23 = sld [smem:[#allocation0]]   ;;  %s3278_s24 = smov 2048   ;;  %v3279_v0 = vmov 0.0   ;;  %vm3280_vm0 = vmmov 0  }
  0x13   :  { %57 = sst [smem:[#allocation9]] %s3278_s24  ;;  %3124 = vmatprep.subr.bf16.mxu0 %v3279_v0  ;;  %3132 = vmatprep.mubr.msk.bf16.mxu0 %vm3280_vm0, %v3279_v0  ;;  %s3281_s1 = smov 128   ;;  %vm255_vm1 = vcmask 523264   ;;  %vm503_vm2 = vcmask 261120  }
  0x14   :  { %59 = sst [smem:[#allocation9 + $0x1]] %s3278_s24  ;;  %3136 = vmatprep.subr.bf16.mxu1 %v3279_v0  ;;  %3152 = vmatprep.mubr.msk.bf16.mxu1 %vm3280_vm0, %v3279_v0  ;;  %s3282_s25 = smov [#allocation2]  }
  0x15   :  { %63 = sst [smem:[#allocation9 + $0x3]] %s3276_s19  ;;  %s53_s26 = sshll.u32 %s3282_s25, 4  ;;  %s54_s26 = int_to_ptr.vmem [resolvable:$true] %s53_s26 }
  0x16   :  { %65 = sst [smem:[#allocation9 + $0x4]] %s3281_s1  ;;  %s3283_s27 = smov 2  }
  0x17   :  { %67 = sst [smem:[#allocation9 + $0x5]] %s3283_s27  ;;  %s3284_s30 = smov 16  }
  0x18   :  { %71 = sst [smem:[#allocation9 + $0x7]] %s3276_s19  ;;  %s3017_s28 = sshll.u32 %s45_s23, 26 }
  0x19   :  { %73 = sst [smem:[#allocation9 + $0x8]] %s3277_s20  ;;  %s3382_s29 = sadd.s32 134217728, %s3017_s28 }
  0x1a   :  { %61 = sst [smem:[#allocation9 + $0x2]] %s3284_s30  ;;  %s3285_s10 = smov 1024  }
  0x1b   :  { %69 = sst [smem:[#allocation9 + $0x6]] %s3285_s10  ;;  %s3286_s11 = smov [#allocation5]  }
  0x1c   :  { %s3287_s12 = smov [#allocation8]   ;;  %s3288_s15 = smov [#allocation3]  }
  0x1d   :  { %75 = dma.general %s4009_s6, 4096, %s54_s26, %s3286_s11, %s3287_s12, [#allocation9], %s3382_s29, 0  }
  0x1e   :  { %92 = sst [smem:[#allocation11]] %s3278_s24  ;;  %s88_s16 = sshll.u32 %s3288_s15, 4  ;;  %s89_s16 = int_to_ptr.vmem [resolvable:$true] %s88_s16 }
  0x1f   :  { %94 = sst [smem:[#allocation11 + $0x1]] %s3278_s24  ;;  %s3289_s17 = smov [#allocation5 + $0x2]  }
  0x20   :  { %96 = sst [smem:[#allocation11 + $0x2]] %s3284_s30  ;;  %s3290_s18 = smov [#allocation10]  }
  0x21   :  { %98 = sst [smem:[#allocation11 + $0x3]] %s3276_s19  ;;  %s3291_s23 = smov [#allocation2 + $0x100]  }
  0x22   :  { %100 = sst [smem:[#allocation11 + $0x4]] %s3281_s1  ;;  %s125_s25 = sshll.u32 %s3291_s23, 4  ;;  %s126_s25 = int_to_ptr.vmem [resolvable:$true] %s125_s25 }
  0x23   :  { %102 = sst [smem:[#allocation11 + $0x5]] %s3283_s27  ;;  %s111_s11 = scalar_lea.hbm %s4009_s6, 4096 }
  0x24   :  { %104 = sst [smem:[#allocation11 + $0x6]] %s3285_s10  ;;  %s3292_s12 = smov [#allocation5 + $0x1]  }
  0x25   :  { %106 = sst [smem:[#allocation11 + $0x7]] %s3276_s19  ;;  %s3293_s13 = smov [#allocation12]  }
  0x26   :  { %108 = sst [smem:[#allocation11 + $0x8]] %s3277_s20  ;;  %s3294_s14 = smov [#allocation3 + $0x100]  }
  0x27   :  { %110 = dma.general %s4010_s7, 4096, %s89_s16, %s3289_s17, %s3290_s18, [#allocation11], %s3382_s29, 0  }
  0x28   :  { %129 = sst [smem:[#allocation13]] %s3278_s24  ;;  %s162_s15 = sshll.u32 %s3294_s14, 4  ;;  %s163_s15 = int_to_ptr.vmem [resolvable:$true] %s162_s15 }
  0x29   :  { %131 = sst [smem:[#allocation13 + $0x1]] %s3278_s24  ;;  %s148_s17 = scalar_lea.hbm %s4010_s7, 4096 }
  0x2a   :  { %133 = sst [smem:[#allocation13 + $0x2]] %s3284_s30  ;;  %s3296_s18 = smov [#allocation14]  }
  0x2b   :  { %135 = sst [smem:[#allocation13 + $0x3]] %s3276_s19  ;;  %s3298_s7 = smov [#allocation4]  }
  0x2c   :  { %137 = sst [smem:[#allocation13 + $0x4]] %s3281_s1  ;;  %s197_s21 = sshll.u32 %s3298_s7, 4  ;;  %s198_s21 = int_to_ptr.vmem [resolvable:$true] %s197_s21 }
  0x2d   :  { %139 = sst [smem:[#allocation13 + $0x5]] %s3283_s27  ;;  %s3299_s22 = smov 20  }
  0x2e   :  { %141 = sst [smem:[#allocation13 + $0x6]] %s3285_s10  ;;  %s3301_s23 = smov [#allocation5 + $0x4]  }
  0x2f   :  { %143 = sst [smem:[#allocation13 + $0x7]] %s3276_s19 }
  0x30   :  { %145 = sst [smem:[#allocation13 + $0x8]] %s3277_s20 }
  0x31   :  { %147 = dma.general %s111_s11, 4096, %s126_s25, %s3292_s12, %s3293_s13, [#allocation13], %s3382_s29, 0  }
  0x32   :  { %166 = sst [smem:[#allocation15]] %s3278_s24  ;;  %s3302_s25 = smov [#allocation16]  }
  0x33   :  { %168 = sst [smem:[#allocation15 + $0x1]] %s3278_s24  ;;  %s3295_s24 = smov [#allocation5 + $0x3]  }
  0x34   :  { %170 = sst [smem:[#allocation15 + $0x2]] %s3284_s30  ;;  %s3297_s30 = smov 2560  }
  0x35   :  { %172 = sst [smem:[#allocation15 + $0x3]] %s3276_s19 }
  0x36   :  { %174 = sst [smem:[#allocation15 + $0x4]] %s3281_s1 }
  0x37   :  { %176 = sst [smem:[#allocation15 + $0x5]] %s3283_s27 }
  0x38   :  { %178 = sst [smem:[#allocation15 + $0x6]] %s3285_s10  ;;  %s3300_s10 = smov 1280  }
  0x39   :  { %180 = sst [smem:[#allocation15 + $0x7]] %s3276_s19 }
  0x3a   :  { %182 = sst [smem:[#allocation15 + $0x8]] %s3277_s20 }
  0x3b   :  { %184 = dma.general %s148_s17, 4096, %s163_s15, %s3295_s24, %s3296_s18, [#allocation15], %s3382_s29, 0  }
  0x3c   :  { %201 = sst [smem:[#allocation17]] %s3297_s30 }
  0x3d   :  { %203 = sst [smem:[#allocation17 + $0x1]] %s3297_s30 }
  0x3e   :  { %205 = sst [smem:[#allocation17 + $0x2]] %s3299_s22 }
  0x3f   :  { %207 = sst [smem:[#allocation17 + $0x3]] %s3276_s19 }
  0x40   :  { %209 = sst [smem:[#allocation17 + $0x4]] %s3281_s1 }
  0x41   :  { %211 = sst [smem:[#allocation17 + $0x5]] %s3283_s27 }
  0x42   :  { %213 = sst [smem:[#allocation17 + $0x6]] %s3300_s10 }
  0x43   :  { %215 = sst [smem:[#allocation17 + $0x7]] %s3276_s19 }
  0x44   :  { %217 = sst [smem:[#allocation17 + $0x8]] %s3277_s20 }
  0x45   :  { %219 = dma.general %s4011_s8, 5120, %s198_s21, %s3301_s23, %s3302_s25, [#allocation17], %s3382_s29, 0  }
  0x46   :  { %v3213_v1 = vld [vmem:[#allocation6] sm:$0xff]   ;;  %v3214_v2 = vld [vmem:[#allocation6 + $0x8] sm:$0xff]   ;;  %v3215_v4 = vld [vmem:[#allocation6 + $0x10] sm:$0xff]  }
  0x47   :  { %3125 = vmatpush3.bf16.msra.mxu0 %v3213_v1  ;;  %v3217_v3 = vld [vmem:[%s4005_s2] sm:$0xff]   ;;  %v3218_v5 = vld [vmem:[%s4005_s2 + $0x8] sm:$0xff]   ;;  %v3216_v6 = vld [vmem:[#allocation6 + $0x18] sm:$0xff]  }
  0x48   :  { %3126 = vmatprep.subr.bf16.mxu0 %v3279_v0  ;;  %3137 = vmatpush3.bf16.msra.mxu1 %v3217_v3  ;;  %v220_v7 = vld [vmem:[%s4003_s0] sm:$0xff]  ;;  %v3219_v8 = vld [vmem:[%s4005_s2 + $0x10] sm:$0xff]   ;;  %v3220_v10 = vld [vmem:[%s4005_s2 + $0x18] sm:$0xff]  }
  0x49   :  { %3138 = vmatprep.subr.bf16.mxu1 %v3279_v0  ;;  %v230_v9 = vpack.c.bf16 %v220_v7, %v220_v7  ;;  %v3221_v11 = vld [vmem:[%s4005_s2 + $0x20] sm:$0xff]   ;;  %v3222_v12 = vld [vmem:[%s4005_s2 + $0x28] sm:$0xff]   ;;  %v3223_v13 = vld [vmem:[%s4005_s2 + $0x30] sm:$0xff]  }
  0x4a   :  { %v3224_v14 = vld [vmem:[%s4005_s2 + $0x38] sm:$0xff]   ;;  %v3225_v15 = vld [vmem:[%s4006_s3] sm:$0xff]   ;;  %v3226_v16 = vld [vmem:[%s4006_s3 + $0x8] sm:$0xff]  }
  0x4b   :  { %3127 = vmatpush3.bf16.msra.mxu0 %v3214_v2  ;;  %v229_v17 = vld [vmem:[%s4008_s5] ss:$0 sm:$0xff]  ;;  %v3227_v25 = vld [vmem:[%s4006_s3 + $0x10] sm:$0xff]   ;;  %v3228_v26 = vld [vmem:[%s4006_s3 + $0x18] sm:$0xff]  }
  0x4c   :  { %3128 = vmatprep.subr.bf16.mxu0 %v3279_v0  ;;  %3139 = vmatpush3.bf16.msra.mxu1 %v3218_v5  ;;  %v316_v27 = vld [vmem:[%s4008_s5 + $0x8] ss:$0 sm:$0xff]  ;;  %v3229_v34 = vld [vmem:[%s4007_s4] sm:$0xff]   ;;  %v415_v37 = vld [vmem:[%s4008_s5 + $0x10] ss:$0 sm:$0xff] }
  0x4d   :  { %3140 = vmatprep.subr.bf16.mxu1 %v3279_v0  ;;  %v3230_v36 = vld [vmem:[%s4007_s4 + $0x8] sm:$0xff]   ;;  %v489_v45 = vld [vmem:[%s4008_s5 + $0x18] ss:$0 sm:$0xff]  ;;  %v547_v61 = vld [vmem:[%s4008_s5 + $0x20] ss:$0 sm:$0xff] }
  0x4e   :  { %v548_v63 = vld [vmem:[%s4008_s5 + $0x28] ss:$0 sm:$0xff] }
  0x4f   :  { %3129 = vmatpush3.bf16.msra.mxu0 %v3215_v4 }
  0x50   :  { %3130 = vmatprep.subr.bf16.mxu0 %v3279_v0  ;;  %3141 = vmatpush3.bf16.msra.mxu1 %v3219_v8 }
  0x51   :  { %3142 = vmatprep.subr.bf16.mxu1 %v3279_v0 }
  0x53   :  { %3131 = vmatpush3.bf16.msra.mxu0 %v3216_v6 }
  0x54   :  { %3156 = vmatprep.subr.bf16.mxu0 %v3279_v0  ;;  %3143 = vmatpush3.bf16.msra.mxu1 %v3220_v10 }
  0x55   :  { %3144 = vmatprep.subr.bf16.mxu1 %v3279_v0 }
  0x56   :  { %3133 = vmatmul.mubr.msk.bf16.vlgmr.msra.gmra.mrb[0].mxu0 %vm255_vm1, %v230_v9 }
  0x57   :  { %3164 = vmatprep.mubr.msk.bf16.mxu0 %vm3280_vm0, %v3279_v0  ;;  %3157 = vmatpush3.bf16.msra.mxu0 %v3225_v15 }
  0x58   :  { %3145 = vmatpush3.bf16.msra.mxu1 %v3221_v11  ;;  %3158 = vmatprep.subr.bf16.mxu0 %v3279_v0 }
  0x59   :  { %3146 = vmatprep.subr.bf16.mxu1 %v3279_v0 }
  0x5b   :  { %3159 = vmatpush3.bf16.msra.mxu0 %v3226_v16 }
  0x5c   :  { %3147 = vmatpush3.bf16.msra.mxu1 %v3222_v12  ;;  %3160 = vmatprep.subr.bf16.mxu0 %v3279_v0 }
  0x5d   :  { %3148 = vmatprep.subr.bf16.mxu1 %v3279_v0 }
  0x5f   :  { %3161 = vmatpush3.bf16.msra.mxu0 %v3227_v25 }
  0x60   :  { %3149 = vmatpush3.bf16.msra.mxu1 %v3223_v13  ;;  %3162 = vmatprep.subr.bf16.mxu0 %v3279_v0 }
  0x61   :  { %3150 = vmatprep.subr.bf16.mxu1 %v3279_v0 }
  0x63   :  { %3163 = vmatpush3.bf16.msra.mxu0 %v3228_v26 }
  0x64   :  { %3151 = vmatpush3.bf16.msra.mxu1 %v3224_v14  ;;  %3168 = vmatprep.subr.bf16.mxu0 %v3279_v0 }
 0x129   :  { %v293_v18 = vpop.f32.mrb[0].mxu0 }
 0x12a   :  { %v294_v19 = vadd.f32 %v293_v18, %v229_v17  ;;  %v3134_v20 = vpop.f32.mrb[1].mxu0 }
 0x12b   :  { %v296_v21 = vpop.f32.mrb[2].mxu0 }
 0x12c   :  { %v299_v22 = vmax.f32 %v294_v19, 0.0  ;;  %v3135_v23 = vpop.f32.mrb[3].mxu0 }
 0x12e   :  { %v317_v24 = vpack.c.bf16 %v299_v22, %v299_v22 }
 0x130   :  { %3153 = vmatmul.mubr.bf16.vlgmr.msra.gmra.mrb[0].mxu1 %v317_v24 }
 0x203   :  { %v400_v28 = vpop.f32.mrb[0].mxu1 }
 0x204   :  { %v401_v29 = vadd.f32 %v400_v28, %v316_v27  ;;  %v3154_v30 = vpop.f32.mrb[1].mxu1 }
 0x205   :  { %v403_v31 = vpop.f32.mrb[2].mxu1 }
 0x206   :  { %v406_v32 = vmax.f32 %v401_v29, 0.0  ;;  %v3155_v33 = vpop.f32.mrb[3].mxu1 }
 0x208   :  { %v416_v35 = vpack.c.bf16 %v406_v32, %v406_v32 }
 0x20a   :  { %3165 = vmatmul.mubr.msk.bf16.vlgmr.msra.gmra.mrb[4].mxu0 %vm255_vm1, %v416_v35 }
 0x20b   :  { %3169 = vmatpush3.bf16.msra.mxu0 %v3229_v34  ;;  %3172 = vmatprep.mubr.msk.bf16.mxu0 %vm3280_vm0, %v3279_v0 }
 0x20c   :  { %3170 = vmatprep.subr.bf16.mxu0 %v3279_v0 }
 0x20f   :  { %3171 = vmatpush3.bf16.msra.mxu0 %v3230_v36 }
 0x2dd   :  { %v478_v38 = vpop.f32.mrb[4].mxu0 }
 0x2de   :  { %v479_v39 = vadd.f32 %v478_v38, %v415_v37  ;;  %v3166_v40 = vpop.f32.mrb[5].mxu0 }
 0x2df   :  { %v481_v41 = vpop.f32.mrb[6].mxu0 }
 0x2e0   :  { %v484_v42 = vmax.f32 %v479_v39, 0.0  ;;  %v3167_v43 = vpop.f32.mrb[7].mxu0 }
 0x2e2   :  { %v490_v44 = vpack.c.bf16 %v484_v42, %v484_v42 }
 0x2e4   :  { %3173 = vmatmul.mubr.msk.bf16.vlgmr.msra.gmra.mrb[8].mxu0 %vm503_vm2, %v490_v44 }
 0x3b7   :  { %v541_v46 = vpop.f32.mrb[8].mxu0 }
 0x3b8   :  { %v542_v47 = vadd.f32 %v541_v46, %v489_v45  ;;  %v3174_v48 = vpop.f32.mrb[9].mxu0 }
 0x3b9   :  { %v544_v49 = vpop.f32.mrb[10].mxu0 }
 0x3ba   :  { %v3175_v50 = vpop.f32.mrb[11].mxu0  ;;  %v549_v51 = vsel %vm503_vm2, %v542_v47, 0.0 }
 0x3bb   :  { %550 = vadd.xlane.f32.xlu0 %v549_v51 }
 0x448   :  { %v551_v52 = vpop.xlane.xlu0 %550 }
 0x449   :  { %v553_v53 = vmul.f32 0.03125, %v551_v52 }
 0x44b   :  { %v554_v54 = vsub.f32 %v542_v47, %v553_v53 }
 0x44d   :  { %v555_v55 = vmul.f32 %v554_v54, %v554_v54 }
 0x44f   :  { %v556_v56 = vsel %vm503_vm2, %v555_v55, 0.0 }
 0x450   :  { %557 = vadd.xlane.f32.xlu0 %v556_v56 }
 0x4dd   :  { %v558_v57 = vpop.xlane.xlu0 %557 }
 0x4de   :  { %v559_v58 = vmul.f32 0.03125, %v558_v57 }
 0x4e0   :  { %v560_v59 = vadd.f32 1e-05, %v559_v58 }
 0x4e2   :  { %3231 = vrsqrt.f32 %v560_v59 }
 0x4ec   :  { %v3232_v60 = vpop.eup %3231 }
 0x4ed   :  { %v562_v62 = vmul.f32 %v3232_v60, %v554_v54 }
 0x4ef   :  { %v563_v1 = vmul.f32 %v562_v62, %v547_v61 }
 0x4f1   :  { %v3526_v2 = vadd.f32 %v563_v1, %v548_v63 }
 0x4f2   :  { %3265 = dma.done.wait [#allocation5], 4096 }
 0x4f3   :  { %3266 = vsyncadd [#allocation5], 4294963200  ;;  %v3303_v3 = vmov 0   ;;  %v570_v4 = vld [vmem:[#allocation2 + $0x8] sm:$0xff]  ;;  %v572_v5 = vld [vmem:[#allocation2 + $0x18] sm:$0xff]  ;;  %v609_v14 = vpack.c.bf16 %v3526_v2, %v3526_v2  ;;  %v612_v37 = vlaneseq }
 0x4f4   :  { %727 = vmatprep.mubr.bf16.mxu1 %v3303_v3  ;;  %768 = vmatprep.mubr.bf16.mxu0 %v3303_v3  ;;  %v569_v6 = vld [vmem:[#allocation2] sm:$0xff]  ;;  %v571_v7 = vld [vmem:[#allocation2 + $0x10] sm:$0xff]  ;;  %v586_v8 = vld [vmem:[#allocation2 + $0x88] sm:$0xff] }
 0x4f5   :  { %695 = vmatprep.subr.bf16.mxu1 %v570_v4  ;;  %736 = vmatprep.subr.bf16.mxu0 %v572_v5  ;;  %v588_v9 = vld [vmem:[#allocation2 + $0x98] sm:$0xff]  ;;  %v585_v10 = vld [vmem:[#allocation2 + $0x80] sm:$0xff]  ;;  %v587_v11 = vld [vmem:[#allocation2 + $0x90] sm:$0xff]  ;;  %v613_v38 = vshrl.u32 %v612_v37, 7 }
 0x4f6   :  { %696 = vmatpush1.bf16.msra.mxu1 %v569_v6  ;;  %737 = vmatpush1.bf16.msra.mxu0 %v571_v7  ;;  %v574_v12 = vld [vmem:[#allocation2 + $0x28] sm:$0xff]  ;;  %v576_v13 = vld [vmem:[#allocation2 + $0x38] sm:$0xff]  ;;  %v573_v15 = vld [vmem:[#allocation2 + $0x20] sm:$0xff] }
 0x4f7   :  { %697 = vmatprep.subr.bf16.mxu1 %v586_v8  ;;  %738 = vmatprep.subr.bf16.mxu0 %v588_v9  ;;  %v575_v16 = vld [vmem:[#allocation2 + $0x30] sm:$0xff]  ;;  %v590_v17 = vld [vmem:[#allocation2 + $0xa8] sm:$0xff]  ;;  %v592_v18 = vld [vmem:[#allocation2 + $0xb8] sm:$0xff]  ;;  %v3552_v42 = vsub.s32 0, %v613_v38  ;;  %v3554_v43 = vsub.s32 2, %v613_v38  ;;  %v3556_v44 = vsub.s32 1, %v613_v38 }
 0x4f8   :  { %v589_v19 = vld [vmem:[#allocation2 + $0xa0] sm:$0xff]  ;;  %v591_v20 = vld [vmem:[#allocation2 + $0xb0] sm:$0xff]  ;;  %v578_v21 = vld [vmem:[#allocation2 + $0x48] sm:$0xff]  ;;  %v3558_v45 = vsub.s32 3, %v613_v38  ;;  %v3568_v56 = vsub.s32 4, %v613_v38  ;;  %v3570_v57 = vsub.s32 6, %v613_v38 }
 0x4f9   :  { %v580_v22 = vld [vmem:[#allocation2 + $0x58] sm:$0xff]  ;;  %v577_v23 = vld [vmem:[#allocation2 + $0x40] sm:$0xff]  ;;  %v579_v24 = vld [vmem:[#allocation2 + $0x50] sm:$0xff]  ;;  %v3576_v62 = vsub.s32 5, %v613_v38  ;;  %v3578_v63 = vsub.s32 7, %v613_v38 }
 0x4fa   :  { %698 = vmatpush1.bf16.msra.mxu1 %v585_v10  ;;  %739 = vmatpush1.bf16.msra.mxu0 %v587_v11  ;;  %v594_v25 = vld [vmem:[#allocation2 + $0xc8] sm:$0xff]  ;;  %v596_v26 = vld [vmem:[#allocation2 + $0xd8] sm:$0xff]  ;;  %v593_v27 = vld [vmem:[#allocation2 + $0xc0] sm:$0xff] }
 0x4fb   :  { %777 = vmatprep.subr.bf16.mxu1 %v574_v12  ;;  %818 = vmatprep.subr.bf16.mxu0 %v576_v13  ;;  %v595_v28 = vld [vmem:[#allocation2 + $0xd0] sm:$0xff]  ;;  %v582_v29 = vld [vmem:[#allocation2 + $0x68] sm:$0xff]  ;;  %v584_v30 = vld [vmem:[#allocation2 + $0x78] sm:$0xff] }
 0x4fc   :  { %v581_v31 = vld [vmem:[#allocation2 + $0x60] sm:$0xff]  ;;  %v583_v32 = vld [vmem:[#allocation2 + $0x70] sm:$0xff]  ;;  %v598_v33 = vld [vmem:[#allocation2 + $0xe8] sm:$0xff] }
 0x4fd   :  { %3052 = vmatmul.mubr.msk.bf16.vlgmr.msra.gmra.mrb[4].mxu1 %vm503_vm2, %v609_v14  ;;  %3053 = vmatmul.mubr.msk.bf16.vlgmr.msra.gmra.mrb[12].mxu0 %vm503_vm2, %v609_v14  ;;  %v600_v34 = vld [vmem:[#allocation2 + $0xf8] sm:$0xff]  ;;  %v597_v35 = vld [vmem:[#allocation2 + $0xe0] sm:$0xff]  ;;  %v599_v36 = vld [vmem:[#allocation2 + $0xf0] sm:$0xff] }
 0x4fe   :  { %778 = vmatpush1.bf16.msra.mxu1 %v573_v15  ;;  %819 = vmatpush1.bf16.msra.mxu0 %v575_v16  ;;  %v3048_v39 = vld [vmem:[%s4008_s5 + $0x1] ss:$8 sm:$0xf] }
 0x4ff   :  { %779 = vmatprep.subr.bf16.mxu1 %v590_v17  ;;  %820 = vmatprep.subr.bf16.mxu0 %v592_v18  ;;  %v3049_v40 = vld [vmem:[%s4008_s5 + $0x1] ss:$8 sm:$0xf0] }
 0x500   :  { %809 = vmatprep.mubr.bf16.mxu1 %v3303_v3  ;;  %850 = vmatprep.mubr.bf16.mxu0 %v3303_v3  ;;  %v604_v41 = vor.u32 %v3049_v40, %v3048_v39  ;;  %v3050_v13 = vld [vmem:[%s4008_s5 + $0x41] ss:$8 sm:$0xf] }
 0x502   :  { %780 = vmatpush1.bf16.msra.mxu1 %v589_v19  ;;  %821 = vmatpush1.bf16.msra.mxu0 %v591_v20  ;;  %v615_v46 = vrot.slane %v604_v41, %v3552_v42  ;;  %v623_v47 = vrot.slane %v604_v41, %v3554_v43  ;;  %v619_v48 = vrot.slane %v604_v41, %v3556_v44 }
 0x503   :  { %859 = vmatprep.subr.bf16.mxu1 %v578_v21  ;;  %900 = vmatprep.subr.bf16.mxu0 %v580_v22  ;;  %v627_v49 = vrot.slane %v604_v41, %v3558_v45  ;;  %v631_v9 = vrot.slane %v604_v41, %v3568_v56  ;;  %v639_v10 = vrot.slane %v604_v41, %v3570_v57 }
 0x504   :  { %v635_v11 = vrot.slane %v604_v41, %v3576_v62  ;;  %v643_v12 = vrot.slane %v604_v41, %v3578_v63 }
 0x505   :  { %3054 = vmatmul.mubr.msk.bf16.vlgmr.msra.gmra.mrb[8].mxu1 %vm503_vm2, %v609_v14  ;;  %3055 = vmatmul.mubr.msk.bf16.vlgmr.msra.gmra.mrb[16].mxu0 %vm503_vm2, %v609_v14 }
 0x506   :  { %860 = vmatpush1.bf16.msra.mxu1 %v577_v23  ;;  %901 = vmatpush1.bf16.msra.mxu0 %v579_v24 }
 0x507   :  { %861 = vmatprep.subr.bf16.mxu1 %v594_v25  ;;  %902 = vmatprep.subr.bf16.mxu0 %v596_v26 }
 0x508   :  { %891 = vmatprep.mubr.bf16.mxu1 %v3303_v3  ;;  %932 = vmatprep.mubr.bf16.mxu0 %v3303_v3 }
 0x50a   :  { %862 = vmatpush1.bf16.msra.mxu1 %v593_v27  ;;  %903 = vmatpush1.bf16.msra.mxu0 %v595_v28 }
 0x50b   :  { %941 = vmatprep.subr.bf16.mxu1 %v582_v29  ;;  %982 = vmatprep.subr.bf16.mxu0 %v584_v30 }
 0x50d   :  { %3056 = vmatmul.mubr.msk.bf16.vlgmr.msra.gmra.mrb[12].mxu1 %vm503_vm2, %v609_v14  ;;  %3057 = vmatmul.mubr.msk.bf16.vlgmr.msra.gmra.mrb[20].mxu0 %vm503_vm2, %v609_v14 }
 0x50e   :  { %942 = vmatpush1.bf16.msra.mxu1 %v581_v31  ;;  %983 = vmatpush1.bf16.msra.mxu0 %v583_v32 }
 0x50f   :  { %943 = vmatprep.subr.bf16.mxu1 %v598_v33  ;;  %984 = vmatprep.subr.bf16.mxu0 %v600_v34 }
 0x510   :  { %973 = vmatprep.mubr.bf16.mxu1 %v3303_v3  ;;  %1014 = vmatprep.mubr.bf16.mxu0 %v3303_v3 }
 0x512   :  { %944 = vmatpush1.bf16.msra.mxu1 %v597_v35  ;;  %985 = vmatpush1.bf16.msra.mxu0 %v599_v36 }
 0x515   :  { %3058 = vmatmul.mubr.msk.bf16.vlgmr.msra.gmra.mrb[16].mxu1 %vm503_vm2, %v609_v14  ;;  %3059 = vmatmul.mubr.msk.bf16.vlgmr.msra.gmra.mrb[24].mxu0 %vm503_vm2, %v609_v14  ;;  %v3051_v14 = vld [vmem:[%s4008_s5 + $0x41] ss:$8 sm:$0xf0] }
 0x516   :  { %v608_v21 = vor.u32 %v3051_v14, %v3050_v13 }
 0x518   :  { %v647_v32 = vrot.slane %v608_v21, %v3552_v42  ;;  %v655_v33 = vrot.slane %v608_v21, %v3554_v43  ;;  %v651_v34 = vrot.slane %v608_v21, %v3556_v44  ;;  %v659_v35 = vrot.slane %v608_v21, %v3558_v45 }
 0x5d0   :  { %v729_v50 = vpop.f32.mrb[4].mxu1  ;;  %v770_v51 = vpop.f32.mrb[12].mxu0 }
 0x5d1   :  { %v3564_v52 = vadd.f32 %v729_v50, %v615_v46  ;;  %v3566_v53 = vadd.f32 %v770_v51, %v623_v47  ;;  %v731_v54 = vpop.f32.mrb[5].mxu1  ;;  %v772_v55 = vpop.f32.mrb[13].mxu0 }
 0x5d2   :  { %v3572_v58 = vadd.f32 %v731_v54, %v619_v48  ;;  %v3574_v59 = vadd.f32 %v772_v55, %v627_v49  ;;  %v733_v60 = vpop.f32.mrb[6].mxu1  ;;  %v774_v61 = vpop.f32.mrb[14].mxu0 }
 0x5d3   :  { %v1023_v1 = vmax.f32 %v3564_v52, 0.0  ;;  %v1025_v4 = vmax.f32 %v3566_v53, 0.0  ;;  %v734_v5 = vpop.f32.mrb[7].mxu1  ;;  %v775_v6 = vpop.f32.mrb[15].mxu0 }
 0x5d4   :  { %v1024_v7 = vmax.f32 %v3572_v58, 0.0  ;;  %v1026_v8 = vmax.f32 %v3574_v59, 0.0  ;;  %v663_v5 = vrot.slane %v608_v21, %v3568_v56  ;;  %v671_v6 = vrot.slane %v608_v21, %v3570_v57 }
 0x5d8   :  { %v811_v15 = vpop.f32.mrb[8].mxu1  ;;  %v852_v16 = vpop.f32.mrb[16].mxu0 }
 0x5d9   :  { %v3594_v17 = vadd.f32 %v811_v15, %v631_v9  ;;  %v3596_v18 = vadd.f32 %v852_v16, %v639_v10  ;;  %v813_v19 = vpop.f32.mrb[9].mxu1  ;;  %v854_v20 = vpop.f32.mrb[17].mxu0  ;;  %v667_v9 = vrot.slane %v608_v21, %v3576_v62  ;;  %v675_v10 = vrot.slane %v608_v21, %v3578_v63 }
 0x5da   :  { %v3598_v22 = vadd.f32 %v813_v19, %v635_v11  ;;  %v3600_v23 = vadd.f32 %v854_v20, %v643_v12  ;;  %v815_v24 = vpop.f32.mrb[10].mxu1  ;;  %v856_v25 = vpop.f32.mrb[18].mxu0 }
 0x5db   :  { %v1027_v26 = vmax.f32 %v3594_v17, 0.0  ;;  %v1029_v27 = vmax.f32 %v3596_v18, 0.0  ;;  %v816_v28 = vpop.f32.mrb[11].mxu1  ;;  %v857_v29 = vpop.f32.mrb[19].mxu0 }
 0x5dc   :  { %v1028_v30 = vmax.f32 %v3598_v22, 0.0  ;;  %v1030_v31 = vmax.f32 %v3600_v23, 0.0 }
 0x5e0   :  { %v893_v36 = vpop.f32.mrb[12].mxu1  ;;  %v934_v37 = vpop.f32.mrb[20].mxu0 }
 0x5e1   :  { %v3610_v38 = vadd.f32 %v893_v36, %v647_v32  ;;  %v3612_v39 = vadd.f32 %v934_v37, %v655_v33  ;;  %v895_v40 = vpop.f32.mrb[13].mxu1  ;;  %v936_v41 = vpop.f32.mrb[21].mxu0 }
 0x5e2   :  { %v3614_v46 = vadd.f32 %v895_v40, %v651_v34  ;;  %v3616_v47 = vadd.f32 %v936_v41, %v659_v35  ;;  %v897_v48 = vpop.f32.mrb[14].mxu1  ;;  %v938_v49 = vpop.f32.mrb[22].mxu0 }
 0x5e3   :  { %v1031_v50 = vmax.f32 %v3610_v38, 0.0  ;;  %v1033_v51 = vmax.f32 %v3612_v39, 0.0  ;;  %v898_v54 = vpop.f32.mrb[15].mxu1  ;;  %v939_v55 = vpop.f32.mrb[23].mxu0 }
 0x5e4   :  { %v1032_v60 = vmax.f32 %v3614_v46, 0.0  ;;  %v1034_v61 = vmax.f32 %v3616_v47, 0.0 }
 0x5e8   :  { %v975_v11 = vpop.f32.mrb[16].mxu1  ;;  %v1016_v12 = vpop.f32.mrb[24].mxu0 }
 0x5e9   :  { %v3626_v13 = vadd.f32 %v975_v11, %v663_v5  ;;  %v3628_v14 = vadd.f32 %v1016_v12, %v671_v6  ;;  %v977_v15 = vpop.f32.mrb[17].mxu1  ;;  %v1018_v16 = vpop.f32.mrb[25].mxu0 }
 0x5ea   :  { %v3630_v19 = vadd.f32 %v977_v15, %v667_v9  ;;  %v3632_v20 = vadd.f32 %v1018_v16, %v675_v10  ;;  %v979_v24 = vpop.f32.mrb[18].mxu1  ;;  %v1020_v25 = vpop.f32.mrb[26].mxu0 }
 0x5eb   :  { %v1035_v28 = vmax.f32 %v3626_v13, 0.0  ;;  %v1037_v29 = vmax.f32 %v3628_v14, 0.0  ;;  %v980_v32 = vpop.f32.mrb[19].mxu1  ;;  %v1021_v21 = vpop.f32.mrb[27].mxu0 }
 0x5ec   :  { %v1036_v33 = vmax.f32 %v3630_v19, 0.0  ;;  %v1038_v34 = vmax.f32 %v3632_v20, 0.0 }
 0x5ed   :  { %3267 = dma.done.wait [#allocation5 + $0x2], 4096 }
 0x5ee   :  { %3268 = vsyncadd [#allocation5 + $0x2], 4294963200  ;;  %v1075_v35 = vpack.c.bf16 %v1024_v7, %v1024_v7  ;;  %v1077_v36 = vpack.c.bf16 %v1026_v8, %v1026_v8  ;;  %v1042_v37 = vld [vmem:[#allocation3 + $0x8] sm:$0xff]  ;;  %v1044_v40 = vld [vmem:[#allocation3 + $0x18] sm:$0xff]  ;;  %v1074_v8 = vpack.c.bf16 %v1023_v1, %v1023_v1  ;;  %v1076_v5 = vpack.c.bf16 %v1025_v4, %v1025_v4 }
 0x5ef   :  { %v1041_v41 = vld [vmem:[#allocation3] sm:$0xff]  ;;  %1090 = vmatprep.subr.bf16.mxu1 %v1042_v37  ;;  %1130 = vmatprep.subr.bf16.mxu0 %v1044_v40  ;;  %v1043_v48 = vld [vmem:[#allocation3 + $0x10] sm:$0xff]  ;;  %v1058_v49 = vld [vmem:[#allocation3 + $0x88] sm:$0xff]  ;;  %v1079_v12 = vpack.c.bf16 %v1028_v30, %v1028_v30  ;;  %v1081_v15 = vpack.c.bf16 %v1030_v31, %v1030_v31  ;;  %v1078_v22 = vpack.c.bf16 %v1027_v26, %v1027_v26 }
 0x5f0   :  { %1122 = vmatprep.mubr.bf16.mxu1 %v1075_v35  ;;  %1162 = vmatprep.mubr.bf16.mxu0 %v1077_v36  ;;  %v1060_v54 = vld [vmem:[#allocation3 + $0x98] sm:$0xff]  ;;  %v1057_v58 = vld [vmem:[#allocation3 + $0x80] sm:$0xff]  ;;  %v1059_v7 = vld [vmem:[#allocation3 + $0x90] sm:$0xff]  ;;  %v1080_v23 = vpack.c.bf16 %v1029_v27, %v1029_v27  ;;  %v1083_v25 = vpack.c.bf16 %v1032_v60, %v1032_v60  ;;  %v1085_v32 = vpack.c.bf16 %v1034_v61, %v1034_v61 }
 0x5f1   :  { %1091 = vmatpush1.bf16.xpose.msra.mxu1 %v1041_v41  ;;  %1131 = vmatpush1.bf16.xpose.msra.mxu0 %v1043_v48  ;;  %v1046_v55 = vld [vmem:[#allocation3 + $0x28] sm:$0xff]  ;;  %v1048_v59 = vld [vmem:[#allocation3 + $0x38] sm:$0xff]  ;;  %v1045_v6 = vld [vmem:[#allocation3 + $0x20] sm:$0xff]  ;;  %v1082_v46 = vpack.c.bf16 %v1031_v50, %v1031_v50  ;;  %v1084_v47 = vpack.c.bf16 %v1033_v51, %v1033_v51  ;;  %v1087_v36 = vpack.c.bf16 %v1036_v33, %v1036_v33 }
 0x5f2   :  { %1092 = vmatprep.subr.bf16.mxu1 %v1058_v49  ;;  %1132 = vmatprep.subr.bf16.mxu0 %v1060_v54  ;;  %v1047_v9 = vld [vmem:[#allocation3 + $0x30] sm:$0xff]  ;;  %v1062_v10 = vld [vmem:[#allocation3 + $0xa8] sm:$0xff]  ;;  %v1064_v11 = vld [vmem:[#allocation3 + $0xb8] sm:$0xff]  ;;  %v1089_v37 = vpack.c.bf16 %v1038_v34, %v1038_v34  ;;  %v1086_v50 = vpack.c.bf16 %v1035_v28, %v1035_v28  ;;  %v1088_v51 = vpack.c.bf16 %v1037_v29, %v1037_v29 }
 0x5f3   :  { %v1061_v52 = vld [vmem:[#allocation3 + $0xa0] sm:$0xff]  ;;  %v1063_v53 = vld [vmem:[#allocation3 + $0xb0] sm:$0xff]  ;;  %v1050_v1 = vld [vmem:[#allocation3 + $0x48] sm:$0xff] }
 0x5f4   :  { %v1052_v4 = vld [vmem:[#allocation3 + $0x58] sm:$0xff]  ;;  %v1049_v30 = vld [vmem:[#allocation3 + $0x40] sm:$0xff]  ;;  %v1051_v31 = vld [vmem:[#allocation3 + $0x50] sm:$0xff] }
 0x5f5   :  { %v1066_v16 = vld [vmem:[#allocation3 + $0xc8] sm:$0xff]  ;;  %v1068_v24 = vld [vmem:[#allocation3 + $0xd8] sm:$0xff]  ;;  %v1065_v17 = vld [vmem:[#allocation3 + $0xc0] sm:$0xff] }
 0x5f6   :  { %v1067_v18 = vld [vmem:[#allocation3 + $0xd0] sm:$0xff]  ;;  %v1054_v26 = vld [vmem:[#allocation3 + $0x68] sm:$0xff]  ;;  %v1056_v27 = vld [vmem:[#allocation3 + $0x78] sm:$0xff] }
 0x5f7   :  { %v1053_v60 = vld [vmem:[#allocation3 + $0x60] sm:$0xff]  ;;  %v1055_v61 = vld [vmem:[#allocation3 + $0x70] sm:$0xff]  ;;  %v1070_v21 = vld [vmem:[#allocation3 + $0xe8] sm:$0xff] }
 0x5f8   :  { %v1072_v35 = vld [vmem:[#allocation3 + $0xf8] sm:$0xff]  ;;  %v1069_v38 = vld [vmem:[#allocation3 + $0xe0] sm:$0xff]  ;;  %v1071_v39 = vld [vmem:[#allocation3 + $0xf0] sm:$0xff] }
 0x5f9   :  { %1093 = vmatpush1.bf16.xpose.msra.mxu1 %v1057_v58  ;;  %1133 = vmatpush1.bf16.xpose.msra.mxu0 %v1059_v7  ;;  %v1073_v19 = vld [vmem:[%s4008_s5 + $0x30] ss:$0 sm:$0xff] }
 0x5fa   :  { %1170 = vmatprep.subr.bf16.mxu1 %v1046_v55  ;;  %1210 = vmatprep.subr.bf16.mxu0 %v1048_v59 }
 0x600   :  { %1123 = vmatmul.mubr.bf16.vlgmr.msra.gmra.mrb[20].mxu1 %v1074_v8  ;;  %1163 = vmatmul.mubr.bf16.vlgmr.msra.gmra.mrb[28].mxu0 %v1076_v5 }
 0x601   :  { %1171 = vmatpush1.bf16.xpose.msra.mxu1 %v1045_v6  ;;  %1211 = vmatpush1.bf16.xpose.msra.mxu0 %v1047_v9 }
 0x602   :  { %1172 = vmatprep.subr.bf16.mxu1 %v1062_v10  ;;  %1212 = vmatprep.subr.bf16.mxu0 %v1064_v11 }
 0x603   :  { %1202 = vmatprep.mubr.bf16.mxu1 %v1079_v12  ;;  %1242 = vmatprep.mubr.bf16.mxu0 %v1081_v15 }
 0x609   :  { %1173 = vmatpush1.bf16.xpose.msra.mxu1 %v1061_v52  ;;  %1213 = vmatpush1.bf16.xpose.msra.mxu0 %v1063_v53 }
 0x60a   :  { %1250 = vmatprep.subr.bf16.mxu1 %v1050_v1  ;;  %1290 = vmatprep.subr.bf16.mxu0 %v1052_v4 }
 0x610   :  { %1203 = vmatmul.mubr.bf16.vlgmr.msra.gmra.mrb[24].mxu1 %v1078_v22  ;;  %1243 = vmatmul.mubr.bf16.vlgmr.msra.gmra.mrb[32].mxu0 %v1080_v23 }
 0x611   :  { %1251 = vmatpush1.bf16.xpose.msra.mxu1 %v1049_v30  ;;  %1291 = vmatpush1.bf16.xpose.msra.mxu0 %v1051_v31 }
 0x612   :  { %1252 = vmatprep.subr.bf16.mxu1 %v1066_v16  ;;  %1292 = vmatprep.subr.bf16.mxu0 %v1068_v24 }
 0x613   :  { %1282 = vmatprep.mubr.bf16.mxu1 %v1083_v25  ;;  %1322 = vmatprep.mubr.bf16.mxu0 %v1085_v32 }
 0x619   :  { %1253 = vmatpush1.bf16.xpose.msra.mxu1 %v1065_v17  ;;  %1293 = vmatpush1.bf16.xpose.msra.mxu0 %v1067_v18 }
 0x61a   :  { %1330 = vmatprep.subr.bf16.mxu1 %v1054_v26  ;;  %1370 = vmatprep.subr.bf16.mxu0 %v1056_v27 }
 0x620   :  { %1283 = vmatmul.mubr.bf16.vlgmr.msra.gmra.mrb[28].mxu1 %v1082_v46  ;;  %1323 = vmatmul.mubr.bf16.vlgmr.msra.gmra.mrb[36].mxu0 %v1084_v47 }
 0x621   :  { %1331 = vmatpush1.bf16.xpose.msra.mxu1 %v1053_v60  ;;  %1371 = vmatpush1.bf16.xpose.msra.mxu0 %v1055_v61 }
 0x622   :  { %1332 = vmatprep.subr.bf16.mxu1 %v1070_v21  ;;  %1372 = vmatprep.subr.bf16.mxu0 %v1072_v35 }
 0x623   :  { %1362 = vmatprep.mubr.bf16.mxu1 %v1087_v36  ;;  %1402 = vmatprep.mubr.bf16.mxu0 %v1089_v37  ;;  %v3233_v37 = vld [vmem:[%s4007_s4 + $0x10] sm:$0xff]  }
 0x629   :  { %1333 = vmatpush1.bf16.xpose.msra.mxu1 %v1069_v38  ;;  %1373 = vmatpush1.bf16.xpose.msra.mxu0 %v1071_v39  ;;  %v3234_v38 = vld [vmem:[%s4007_s4 + $0x18] sm:$0xff]  }
 0x62a   :  { %3176 = vmatprep.subr.bf16.mxu1 %v3279_v0 }
 0x630   :  { %1363 = vmatmul.mubr.bf16.vlgmr.msra.gmra.mrb[32].mxu1 %v1086_v50  ;;  %1403 = vmatmul.mubr.bf16.vlgmr.msra.gmra.mrb[40].mxu0 %v1088_v51 }
 0x631   :  { %3180 = vmatprep.mubr.msk.bf16.mxu1 %vm3280_vm0, %v3279_v0  ;;  %3177 = vmatpush3.bf16.msra.mxu1 %v3233_v37 }
 0x632   :  { %3178 = vmatprep.subr.bf16.mxu1 %v3279_v0  ;;  %v1433_v0 = vld [vmem:[%s4008_s5 + $0x48] ss:$0 sm:$0xff] }
 0x635   :  { %3179 = vmatpush3.bf16.msra.mxu1 %v3234_v38 }
 0x6d3   :  { %v1124_v20 = vpop.f32.mrb[20].mxu1  ;;  %v1164_v33 = vpop.f32.mrb[28].mxu0 }
 0x6d4   :  { %v1125_v34 = vadd.f32 %v1124_v20, %v1073_v19  ;;  %v1126_v40 = vpop.f32.mrb[21].mxu1  ;;  %v1166_v13 = vpop.f32.mrb[29].mxu0  ;;  %v1411_v19 = vld [vmem:[%s4008_s5 + $0x38] ss:$0 sm:$0xff] }
 0x6d5   :  { %v1127_v41 = vpop.f32.mrb[22].mxu1  ;;  %v1167_v28 = vpop.f32.mrb[30].mxu0 }
 0x6d6   :  { %v1165_v48 = vadd.f32 %v1164_v33, %v1125_v34  ;;  %v1128_v14 = vpop.f32.mrb[23].mxu1  ;;  %v1168_v49 = vpop.f32.mrb[31].mxu0  ;;  %v1412_v33 = vld [vmem:[%s4008_s5 + $0x40] ss:$0 sm:$0xff] }
 0x6e3   :  { %v1204_v29 = vpop.f32.mrb[24].mxu1  ;;  %v1244_v54 = vpop.f32.mrb[32].mxu0 }
 0x6e4   :  { %v1205_v58 = vadd.f32 %v1204_v29, %v1165_v48  ;;  %v1206_v7 = vpop.f32.mrb[25].mxu1  ;;  %v1246_v55 = vpop.f32.mrb[33].mxu0 }
 0x6e5   :  { %v1207_v59 = vpop.f32.mrb[26].mxu1  ;;  %v1247_v8 = vpop.f32.mrb[34].mxu0 }
 0x6e6   :  { %v1245_v5 = vadd.f32 %v1244_v54, %v1205_v58  ;;  %v1208_v6 = vpop.f32.mrb[27].mxu1  ;;  %v1248_v9 = vpop.f32.mrb[35].mxu0 }
 0x6f3   :  { %v1284_v10 = vpop.f32.mrb[28].mxu1  ;;  %v1324_v11 = vpop.f32.mrb[36].mxu0 }
 0x6f4   :  { %v1285_v12 = vadd.f32 %v1284_v10, %v1245_v5  ;;  %v1286_v15 = vpop.f32.mrb[29].mxu1  ;;  %v1326_v52 = vpop.f32.mrb[37].mxu0  ;;  %v1490_v10 = vld [vmem:[%s4008_s5 + $0x50] ss:$0 sm:$0xff] }
 0x6f5   :  { %v1287_v53 = vpop.f32.mrb[30].mxu1  ;;  %v1327_v1 = vpop.f32.mrb[38].mxu0 }
 0x6f6   :  { %v1325_v4 = vadd.f32 %v1324_v11, %v1285_v12  ;;  %v1288_v22 = vpop.f32.mrb[31].mxu1  ;;  %v1328_v23 = vpop.f32.mrb[39].mxu0  ;;  %v1491_v12 = vld [vmem:[%s4008_s5 + $0x58] ss:$0 sm:$0xff] }
 0x703   :  { %v1364_v30 = vpop.f32.mrb[32].mxu1  ;;  %v1404_v31 = vpop.f32.mrb[40].mxu0 }
 0x704   :  { %v1365_v16 = vadd.f32 %v1364_v30, %v1325_v4  ;;  %v1366_v24 = vpop.f32.mrb[33].mxu1  ;;  %v1406_v25 = vpop.f32.mrb[41].mxu0 }
 0x705   :  { %v1367_v32 = vpop.f32.mrb[34].mxu1  ;;  %v1407_v17 = vpop.f32.mrb[42].mxu0 }
 0x706   :  { %v1405_v18 = vadd.f32 %v1404_v31, %v1365_v16  ;;  %v1368_v26 = vpop.f32.mrb[35].mxu1  ;;  %v1408_v27 = vpop.f32.mrb[43].mxu0 }
 0x708   :  { %v1410_v46 = vadd.f32 %v1405_v18, %v3526_v2 }
 0x70a   :  { %v1413_v47 = vsel %vm503_vm2, %v1410_v46, 0.0 }
 0x70b   :  { %1414 = vadd.xlane.f32.xlu0 %v1413_v47 }
 0x798   :  { %v1415_v60 = vpop.xlane.xlu0 %1414 }
 0x799   :  { %v1416_v61 = vmul.f32 0.03125, %v1415_v60 }
 0x79b   :  { %v1417_v21 = vsub.f32 %v1410_v46, %v1416_v61 }
 0x79d   :  { %v1418_v35 = vmul.f32 %v1417_v21, %v1417_v21 }
 0x79f   :  { %v1419_v36 = vsel %vm503_vm2, %v1418_v35, 0.0 }
 0x7a0   :  { %1420 = vadd.xlane.f32.xlu0 %v1419_v36 }
 0x82d   :  { %v1421_v2 = vpop.xlane.xlu0 %1420 }
 0x82e   :  { %v1422_v39 = vmul.f32 0.03125, %v1421_v2 }
 0x830   :  { %v1423_v50 = vadd.f32 1e-05, %v1422_v39 }
 0x832   :  { %3235 = vrsqrt.f32 %v1423_v50 }
 0x83c   :  { %v3236_v51 = vpop.eup %3235 }
 0x83d   :  { %v1425_v20 = vmul.f32 %v3236_v51, %v1417_v21 }
 0x83f   :  { %v1426_v34 = vmul.f32 %v1425_v20, %v1411_v19 }
 0x841   :  { %v1427_v40 = vadd.f32 %v1426_v34, %v1412_v33 }
 0x843   :  { %v1434_v13 = vpack.c.bf16 %v1427_v40, %v1427_v40 }
 0x845   :  { %3181 = vmatmul.mubr.msk.bf16.vlgmr.msra.gmra.mrb[36].mxu1 %vm503_vm2, %v1434_v13 }
 0x918   :  { %v1484_v41 = vpop.f32.mrb[36].mxu1 }
 0x919   :  { %v1485_v28 = vadd.f32 %v1484_v41, %v1433_v0  ;;  %v3182_v48 = vpop.f32.mrb[37].mxu1 }
 0x91a   :  { %v1487_v14 = vpop.f32.mrb[38].mxu1 }
 0x91b   :  { %v3183_v49 = vpop.f32.mrb[39].mxu1  ;;  %v1492_v29 = vsel %vm503_vm2, %v1485_v28, 0.0 }
 0x91c   :  { %1493 = vadd.xlane.f32.xlu1 %v1492_v29 }
 0x9a9   :  { %v1494_v54 = vpop.xlane.xlu1 %1493 }
 0x9aa   :  { %v1495_v58 = vmul.f32 0.03125, %v1494_v54 }
 0x9ac   :  { %v1496_v7 = vsub.f32 %v1485_v28, %v1495_v58 }
 0x9ae   :  { %v1497_v55 = vmul.f32 %v1496_v7, %v1496_v7 }
 0x9b0   :  { %v1498_v59 = vsel %vm503_vm2, %v1497_v55, 0.0 }
 0x9b1   :  { %1499 = vadd.xlane.f32.xlu1 %v1498_v59 }
 0xa3e   :  { %v1500_v8 = vpop.xlane.xlu1 %1499 }
 0xa3f   :  { %v1501_v5 = vmul.f32 0.03125, %v1500_v8 }
 0xa41   :  { %v1502_v6 = vadd.f32 1e-05, %v1501_v5 }
 0xa43   :  { %3237 = vrsqrt.f32 %v1502_v6 }
 0xa4d   :  { %v3238_v9 = vpop.eup %3237 }
 0xa4e   :  { %v1504_v11 = vmul.f32 %v3238_v9, %v1496_v7 }
 0xa50   :  { %v1505_v15 = vmul.f32 %v1504_v11, %v1490_v10 }
 0xa52   :  { %v3720_v52 = vadd.f32 %v1505_v15, %v1491_v12 }
 0xa53   :  { %3269 = dma.done.wait [#allocation5 + $0x1], 4096 }
 0xa54   :  { %3270 = vsyncadd [#allocation5 + $0x1], 4294963200  ;;  %1667 = vmatprep.mubr.bf16.mxu0 %v3303_v3  ;;  %1708 = vmatprep.mubr.bf16.mxu1 %v3303_v3  ;;  %v1510_v53 = vld [vmem:[#allocation2 + $0x108] sm:$0xff]  ;;  %v1512_v1 = vld [vmem:[#allocation2 + $0x118] sm:$0xff]  ;;  %v1549_v32 = vpack.c.bf16 %v3720_v52, %v3720_v52 }
 0xa55   :  { %v1509_v4 = vld [vmem:[#allocation2 + $0x100] sm:$0xff]  ;;  %1635 = vmatprep.subr.bf16.mxu0 %v1510_v53  ;;  %1676 = vmatprep.subr.bf16.mxu1 %v1512_v1  ;;  %v1511_v22 = vld [vmem:[#allocation2 + $0x110] sm:$0xff]  ;;  %v1526_v23 = vld [vmem:[#allocation2 + $0x188] sm:$0xff] }
 0xa56   :  { %v1528_v30 = vld [vmem:[#allocation2 + $0x198] sm:$0xff]  ;;  %1636 = vmatpush1.bf16.msra.mxu0 %v1509_v4  ;;  %1677 = vmatpush1.bf16.msra.mxu1 %v1511_v22  ;;  %v1525_v31 = vld [vmem:[#allocation2 + $0x180] sm:$0xff]  ;;  %v1527_v16 = vld [vmem:[#allocation2 + $0x190] sm:$0xff] }
 0xa57   :  { %1637 = vmatprep.subr.bf16.mxu0 %v1526_v23  ;;  %1678 = vmatprep.subr.bf16.mxu1 %v1528_v30  ;;  %v1514_v24 = vld [vmem:[#allocation2 + $0x128] sm:$0xff]  ;;  %v1516_v25 = vld [vmem:[#allocation2 + $0x138] sm:$0xff]  ;;  %v1513_v17 = vld [vmem:[#allocation2 + $0x120] sm:$0xff] }
 0xa58   :  { %v1515_v18 = vld [vmem:[#allocation2 + $0x130] sm:$0xff]  ;;  %v1530_v26 = vld [vmem:[#allocation2 + $0x1a8] sm:$0xff]  ;;  %v1532_v27 = vld [vmem:[#allocation2 + $0x1b8] sm:$0xff] }
 0xa59   :  { %v1529_v46 = vld [vmem:[#allocation2 + $0x1a0] sm:$0xff]  ;;  %v1531_v47 = vld [vmem:[#allocation2 + $0x1b0] sm:$0xff]  ;;  %v1518_v60 = vld [vmem:[#allocation2 + $0x148] sm:$0xff] }
 0xa5a   :  { %1638 = vmatpush1.bf16.msra.mxu0 %v1525_v31  ;;  %1679 = vmatpush1.bf16.msra.mxu1 %v1527_v16  ;;  %v1520_v61 = vld [vmem:[#allocation2 + $0x158] sm:$0xff]  ;;  %v1517_v21 = vld [vmem:[#allocation2 + $0x140] sm:$0xff]  ;;  %v1519_v35 = vld [vmem:[#allocation2 + $0x150] sm:$0xff] }
 0xa5b   :  { %1717 = vmatprep.subr.bf16.mxu0 %v1514_v24  ;;  %1758 = vmatprep.subr.bf16.mxu1 %v1516_v25  ;;  %v1534_v36 = vld [vmem:[#allocation2 + $0x1c8] sm:$0xff]  ;;  %v1536_v37 = vld [vmem:[#allocation2 + $0x1d8] sm:$0xff]  ;;  %v1533_v38 = vld [vmem:[#allocation2 + $0x1c0] sm:$0xff] }
 0xa5c   :  { %v1535_v2 = vld [vmem:[#allocation2 + $0x1d0] sm:$0xff]  ;;  %v1522_v39 = vld [vmem:[#allocation2 + $0x168] sm:$0xff]  ;;  %v1524_v50 = vld [vmem:[#allocation2 + $0x178] sm:$0xff] }
 0xa5d   :  { %3071 = vmatmul.mubr.msk.bf16.vlgmr.msra.gmra.mrb[44].mxu0 %vm503_vm2, %v1549_v32  ;;  %3072 = vmatmul.mubr.msk.bf16.vlgmr.msra.gmra.mrb[40].mxu1 %vm503_vm2, %v1549_v32  ;;  %v1521_v51 = vld [vmem:[#allocation2 + $0x160] sm:$0xff]  ;;  %v1523_v19 = vld [vmem:[#allocation2 + $0x170] sm:$0xff]  ;;  %v1538_v20 = vld [vmem:[#allocation2 + $0x1e8] sm:$0xff] }
 0xa5e   :  { %1718 = vmatpush1.bf16.msra.mxu0 %v1513_v17  ;;  %1759 = vmatpush1.bf16.msra.mxu1 %v1515_v18  ;;  %v1540_v33 = vld [vmem:[#allocation2 + $0x1f8] sm:$0xff]  ;;  %v1537_v34 = vld [vmem:[#allocation2 + $0x1e0] sm:$0xff]  ;;  %v1539_v40 = vld [vmem:[#allocation2 + $0x1f0] sm:$0xff] }
 0xa5f   :  { %1719 = vmatprep.subr.bf16.mxu0 %v1530_v26  ;;  %1760 = vmatprep.subr.bf16.mxu1 %v1532_v27  ;;  %v3067_v13 = vld [vmem:[%s4008_s5 + $0x2] ss:$8 sm:$0xf] }
 0xa60   :  { %1749 = vmatprep.mubr.bf16.mxu0 %v3303_v3  ;;  %1790 = vmatprep.mubr.bf16.mxu1 %v3303_v3  ;;  %v3068_v0 = vld [vmem:[%s4008_s5 + $0x2] ss:$8 sm:$0xf0] }
 0xa61   :  { %v1544_v41 = vor.u32 %v3068_v0, %v3067_v13  ;;  %v3069_v31 = vld [vmem:[%s4008_s5 + $0x42] ss:$8 sm:$0xf] }
 0xa62   :  { %1720 = vmatpush1.bf16.msra.mxu0 %v1529_v46  ;;  %1761 = vmatpush1.bf16.msra.mxu1 %v1531_v47  ;;  %v3070_v16 = vld [vmem:[%s4008_s5 + $0x42] ss:$8 sm:$0xf0] }
 0xa63   :  { %1799 = vmatprep.subr.bf16.mxu0 %v1518_v60  ;;  %1840 = vmatprep.subr.bf16.mxu1 %v1520_v61  ;;  %v1555_v28 = vrot.slane %v1544_v41, %v3552_v42  ;;  %v1563_v48 = vrot.slane %v1544_v41, %v3554_v43  ;;  %v1559_v14 = vrot.slane %v1544_v41, %v3556_v44 }
 0xa64   :  { %v1567_v49 = vrot.slane %v1544_v41, %v3558_v45  ;;  %v1571_v4 = vrot.slane %v1544_v41, %v3568_v56  ;;  %v1579_v22 = vrot.slane %v1544_v41, %v3570_v57  ;;  %v1575_v23 = vrot.slane %v1544_v41, %v3576_v62 }
 0xa65   :  { %3073 = vmatmul.mubr.msk.bf16.vlgmr.msra.gmra.mrb[48].mxu0 %vm503_vm2, %v1549_v32  ;;  %3074 = vmatmul.mubr.msk.bf16.vlgmr.msra.gmra.mrb[44].mxu1 %vm503_vm2, %v1549_v32  ;;  %v1583_v30 = vrot.slane %v1544_v41, %v3578_v63  ;;  %v1548_v27 = vor.u32 %v3070_v16, %v3069_v31 }
 0xa66   :  { %1800 = vmatpush1.bf16.msra.mxu0 %v1517_v21  ;;  %1841 = vmatpush1.bf16.msra.mxu1 %v1519_v35 }
 0xa67   :  { %1801 = vmatprep.subr.bf16.mxu0 %v1534_v36  ;;  %1842 = vmatprep.subr.bf16.mxu1 %v1536_v37 }
 0xa68   :  { %1831 = vmatprep.mubr.bf16.mxu0 %v3303_v3  ;;  %1872 = vmatprep.mubr.bf16.mxu1 %v3303_v3 }
 0xa6a   :  { %1802 = vmatpush1.bf16.msra.mxu0 %v1533_v38  ;;  %1843 = vmatpush1.bf16.msra.mxu1 %v1535_v2 }
 0xa6b   :  { %1881 = vmatprep.subr.bf16.mxu0 %v1522_v39  ;;  %1922 = vmatprep.subr.bf16.mxu1 %v1524_v50  ;;  %v1587_v39 = vrot.slane %v1548_v27, %v3552_v42  ;;  %v1595_v50 = vrot.slane %v1548_v27, %v3554_v43 }
 0xa6d   :  { %3075 = vmatmul.mubr.msk.bf16.vlgmr.msra.gmra.mrb[52].mxu0 %vm503_vm2, %v1549_v32  ;;  %3076 = vmatmul.mubr.msk.bf16.vlgmr.msra.gmra.mrb[48].mxu1 %vm503_vm2, %v1549_v32 }
 0xa6e   :  { %1882 = vmatpush1.bf16.msra.mxu0 %v1521_v51  ;;  %1923 = vmatpush1.bf16.msra.mxu1 %v1523_v19  ;;  %v1591_v51 = vrot.slane %v1548_v27, %v3556_v44  ;;  %v1599_v19 = vrot.slane %v1548_v27, %v3558_v45 }
 0xa6f   :  { %1883 = vmatprep.subr.bf16.mxu0 %v1538_v20  ;;  %1924 = vmatprep.subr.bf16.mxu1 %v1540_v33 }
 0xa70   :  { %1913 = vmatprep.mubr.bf16.mxu0 %v3303_v3  ;;  %1954 = vmatprep.mubr.bf16.mxu1 %v3303_v3 }
 0xa72   :  { %1884 = vmatpush1.bf16.msra.mxu0 %v1537_v34  ;;  %1925 = vmatpush1.bf16.msra.mxu1 %v1539_v40 }
 0xa75   :  { %3077 = vmatmul.mubr.msk.bf16.vlgmr.msra.gmra.mrb[56].mxu0 %vm503_vm2, %v1549_v32  ;;  %3078 = vmatmul.mubr.msk.bf16.vlgmr.msra.gmra.mrb[52].mxu1 %vm503_vm2, %v1549_v32 }
 0xb30   :  { %v1669_v29 = vpop.f32.mrb[44].mxu0  ;;  %v1710_v54 = vpop.f32.mrb[40].mxu1 }
 0xb31   :  { %v3750_v58 = vadd.f32 %v1669_v29, %v1555_v28  ;;  %v3752_v7 = vadd.f32 %v1710_v54, %v1563_v48  ;;  %v1671_v55 = vpop.f32.mrb[45].mxu0  ;;  %v1712_v59 = vpop.f32.mrb[41].mxu1 }
 0xb32   :  { %v3754_v8 = vadd.f32 %v1671_v55, %v1559_v14  ;;  %v3756_v5 = vadd.f32 %v1712_v59, %v1567_v49  ;;  %v1673_v6 = vpop.f32.mrb[46].mxu0  ;;  %v1714_v9 = vpop.f32.mrb[42].mxu1 }
 0xb33   :  { %v1963_v10 = vmax.f32 %v3750_v58, 0.0  ;;  %v1965_v11 = vmax.f32 %v3752_v7, 0.0  ;;  %v1674_v12 = vpop.f32.mrb[47].mxu0  ;;  %v1715_v15 = vpop.f32.mrb[43].mxu1  ;;  %v1603_v9 = vrot.slane %v1548_v27, %v3568_v56 }
 0xb34   :  { %v1964_v53 = vmax.f32 %v3754_v8, 0.0  ;;  %v1966_v1 = vmax.f32 %v3756_v5, 0.0  ;;  %v1611_v12 = vrot.slane %v1548_v27, %v3570_v57  ;;  %v1607_v15 = vrot.slane %v1548_v27, %v3576_v62 }
 0xb38   :  { %v1751_v24 = vpop.f32.mrb[48].mxu0  ;;  %v1792_v25 = vpop.f32.mrb[44].mxu1 }
 0xb39   :  { %v3772_v32 = vadd.f32 %v1751_v24, %v1571_v4  ;;  %v3774_v17 = vadd.f32 %v1792_v25, %v1579_v22  ;;  %v1753_v18 = vpop.f32.mrb[49].mxu0  ;;  %v1794_v26 = vpop.f32.mrb[45].mxu1  ;;  %v1615_v4 = vrot.slane %v1548_v27, %v3578_v63 }
 0xb3a   :  { %v3776_v46 = vadd.f32 %v1753_v18, %v1575_v23  ;;  %v3778_v47 = vadd.f32 %v1794_v26, %v1583_v30  ;;  %v1755_v60 = vpop.f32.mrb[50].mxu0  ;;  %v1796_v61 = vpop.f32.mrb[46].mxu1 }
 0xb3b   :  { %v1967_v21 = vmax.f32 %v3772_v32, 0.0  ;;  %v1969_v35 = vmax.f32 %v3774_v17, 0.0  ;;  %v1756_v36 = vpop.f32.mrb[51].mxu0  ;;  %v1797_v37 = vpop.f32.mrb[47].mxu1 }
 0xb3c   :  { %v1968_v38 = vmax.f32 %v3776_v46, 0.0  ;;  %v1970_v2 = vmax.f32 %v3778_v47, 0.0 }
 0xb40   :  { %v1833_v20 = vpop.f32.mrb[52].mxu0  ;;  %v1874_v33 = vpop.f32.mrb[48].mxu1 }
 0xb41   :  { %v3788_v34 = vadd.f32 %v1833_v20, %v1587_v39  ;;  %v3790_v40 = vadd.f32 %v1874_v33, %v1595_v50  ;;  %v1835_v13 = vpop.f32.mrb[53].mxu0  ;;  %v1876_v0 = vpop.f32.mrb[49].mxu1 }
 0xb42   :  { %v3792_v41 = vadd.f32 %v1835_v13, %v1591_v51  ;;  %v3794_v28 = vadd.f32 %v1876_v0, %v1599_v19  ;;  %v1837_v48 = vpop.f32.mrb[54].mxu0  ;;  %v1878_v14 = vpop.f32.mrb[50].mxu1 }
 0xb43   :  { %v1971_v49 = vmax.f32 %v3788_v34, 0.0  ;;  %v1973_v29 = vmax.f32 %v3790_v40, 0.0  ;;  %v1838_v54 = vpop.f32.mrb[55].mxu0  ;;  %v1879_v55 = vpop.f32.mrb[51].mxu1 }
 0xb44   :  { %v1972_v59 = vmax.f32 %v3792_v41, 0.0  ;;  %v1974_v6 = vmax.f32 %v3794_v28, 0.0 }
 0xb48   :  { %v1915_v22 = vpop.f32.mrb[56].mxu0  ;;  %v1956_v23 = vpop.f32.mrb[52].mxu1 }
 0xb49   :  { %v3804_v30 = vadd.f32 %v1915_v22, %v1603_v9  ;;  %v3806_v31 = vadd.f32 %v1956_v23, %v1611_v12  ;;  %v1917_v16 = vpop.f32.mrb[57].mxu0  ;;  %v1958_v24 = vpop.f32.mrb[53].mxu1 }
 0xb4a   :  { %v3808_v25 = vadd.f32 %v1917_v16, %v1607_v15  ;;  %v3810_v18 = vadd.f32 %v1958_v24, %v1615_v4  ;;  %v1919_v26 = vpop.f32.mrb[58].mxu0  ;;  %v1960_v60 = vpop.f32.mrb[54].mxu1 }
 0xb4b   :  { %v1975_v61 = vmax.f32 %v3804_v30, 0.0  ;;  %v1977_v36 = vmax.f32 %v3806_v31, 0.0  ;;  %v1920_v37 = vpop.f32.mrb[59].mxu0  ;;  %v1961_v27 = vpop.f32.mrb[55].mxu1 }
 0xb4c   :  { %v1976_v39 = vmax.f32 %v3808_v25, 0.0  ;;  %v1978_v50 = vmax.f32 %v3810_v18, 0.0 }
 0xb4d   :  { %3271 = dma.done.wait [#allocation5 + $0x3], 4096 }
 0xb4e   :  { %3272 = vsyncadd [#allocation5 + $0x3], 4294963200  ;;  %v2015_v51 = vpack.c.bf16 %v1964_v53, %v1964_v53  ;;  %v2017_v19 = vpack.c.bf16 %v1966_v1, %v1966_v1  ;;  %v1982_v20 = vld [vmem:[#allocation3 + $0x108] sm:$0xff]  ;;  %v1984_v33 = vld [vmem:[#allocation3 + $0x118] sm:$0xff]  ;;  %v2014_v1 = vpack.c.bf16 %v1963_v10, %v1963_v10  ;;  %v2016_v55 = vpack.c.bf16 %v1965_v11, %v1965_v11 }
 0xb4f   :  { %v1981_v13 = vld [vmem:[#allocation3 + $0x100] sm:$0xff]  ;;  %2030 = vmatprep.subr.bf16.mxu0 %v1982_v20  ;;  %2070 = vmatprep.subr.bf16.mxu1 %v1984_v33  ;;  %v1983_v0 = vld [vmem:[#allocation3 + $0x110] sm:$0xff]  ;;  %v1998_v48 = vld [vmem:[#allocation3 + $0x188] sm:$0xff]  ;;  %v2019_v22 = vpack.c.bf16 %v1968_v38, %v1968_v38  ;;  %v2021_v23 = vpack.c.bf16 %v1970_v2, %v1970_v2  ;;  %v2018_v46 = vpack.c.bf16 %v1967_v21, %v1967_v21 }
 0xb50   :  { %2062 = vmatprep.mubr.bf16.mxu0 %v2015_v51  ;;  %2102 = vmatprep.mubr.bf16.mxu1 %v2017_v19  ;;  %v2000_v14 = vld [vmem:[#allocation3 + $0x198] sm:$0xff]  ;;  %v1997_v8 = vld [vmem:[#allocation3 + $0x180] sm:$0xff]  ;;  %v1999_v53 = vld [vmem:[#allocation3 + $0x190] sm:$0xff]  ;;  %v2020_v47 = vpack.c.bf16 %v1969_v35, %v1969_v35  ;;  %v2023_v26 = vpack.c.bf16 %v1972_v59, %v1972_v59  ;;  %v2025_v60 = vpack.c.bf16 %v1974_v6, %v1974_v6 }
 0xb51   :  { %2031 = vmatpush1.bf16.xpose.msra.mxu0 %v1981_v13  ;;  %2071 = vmatpush1.bf16.xpose.msra.mxu1 %v1983_v0  ;;  %v1986_v54 = vld [vmem:[#allocation3 + $0x128] sm:$0xff]  ;;  %v1988_v5 = vld [vmem:[#allocation3 + $0x138] sm:$0xff]  ;;  %v1985_v9 = vld [vmem:[#allocation3 + $0x120] sm:$0xff]  ;;  %v2022_v41 = vpack.c.bf16 %v1971_v49, %v1971_v49  ;;  %v2024_v28 = vpack.c.bf16 %v1973_v29, %v1973_v29  ;;  %v2027_v51 = vpack.c.bf16 %v1976_v39, %v1976_v39 }
 0xb52   :  { %2032 = vmatprep.subr.bf16.mxu0 %v1998_v48  ;;  %2072 = vmatprep.subr.bf16.mxu1 %v2000_v14  ;;  %v1987_v12 = vld [vmem:[#allocation3 + $0x130] sm:$0xff]  ;;  %v2002_v15 = vld [vmem:[#allocation3 + $0x1a8] sm:$0xff]  ;;  %v2004_v4 = vld [vmem:[#allocation3 + $0x1b8] sm:$0xff]  ;;  %v2029_v19 = vpack.c.bf16 %v1978_v50, %v1978_v50  ;;  %v2026_v49 = vpack.c.bf16 %v1975_v61, %v1975_v61  ;;  %v2028_v29 = vpack.c.bf16 %v1977_v36, %v1977_v36 }
 0xb53   :  { %v2001_v58 = vld [vmem:[#allocation3 + $0x1a0] sm:$0xff]  ;;  %v2003_v7 = vld [vmem:[#allocation3 + $0x1b0] sm:$0xff]  ;;  %v1990_v10 = vld [vmem:[#allocation3 + $0x148] sm:$0xff] }
 0xb54   :  { %v1992_v11 = vld [vmem:[#allocation3 + $0x158] sm:$0xff]  ;;  %v1989_v38 = vld [vmem:[#allocation3 + $0x140] sm:$0xff]  ;;  %v1991_v2 = vld [vmem:[#allocation3 + $0x150] sm:$0xff] }
 0xb55   :  { %v2006_v16 = vld [vmem:[#allocation3 + $0x1c8] sm:$0xff]  ;;  %v2008_v24 = vld [vmem:[#allocation3 + $0x1d8] sm:$0xff]  ;;  %v2005_v32 = vld [vmem:[#allocation3 + $0x1c0] sm:$0xff] }
 0xb56   :  { %v2007_v17 = vld [vmem:[#allocation3 + $0x1d0] sm:$0xff]  ;;  %v1994_v21 = vld [vmem:[#allocation3 + $0x168] sm:$0xff]  ;;  %v1996_v35 = vld [vmem:[#allocation3 + $0x178] sm:$0xff] }
 0xb57   :  { %v1993_v59 = vld [vmem:[#allocation3 + $0x160] sm:$0xff]  ;;  %v1995_v6 = vld [vmem:[#allocation3 + $0x170] sm:$0xff]  ;;  %v2010_v37 = vld [vmem:[#allocation3 + $0x1e8] sm:$0xff] }
 0xb58   :  { %v2012_v27 = vld [vmem:[#allocation3 + $0x1f8] sm:$0xff]  ;;  %v2009_v34 = vld [vmem:[#allocation3 + $0x1e0] sm:$0xff]  ;;  %v2011_v40 = vld [vmem:[#allocation3 + $0x1f0] sm:$0xff] }
 0xb59   :  { %2033 = vmatpush1.bf16.xpose.msra.mxu0 %v1997_v8  ;;  %2073 = vmatpush1.bf16.xpose.msra.mxu1 %v1999_v53  ;;  %v2013_v25 = vld [vmem:[%s4008_s5 + $0x60] ss:$0 sm:$0xff] }
 0xb5a   :  { %2110 = vmatprep.subr.bf16.mxu0 %v1986_v54  ;;  %2150 = vmatprep.subr.bf16.mxu1 %v1988_v5 }
 0xb60   :  { %2063 = vmatmul.mubr.bf16.vlgmr.msra.gmra.mrb[60].mxu0 %v2014_v1  ;;  %2103 = vmatmul.mubr.bf16.vlgmr.msra.gmra.mrb[56].mxu1 %v2016_v55 }
 0xb61   :  { %2111 = vmatpush1.bf16.xpose.msra.mxu0 %v1985_v9  ;;  %2151 = vmatpush1.bf16.xpose.msra.mxu1 %v1987_v12 }
 0xb62   :  { %2112 = vmatprep.subr.bf16.mxu0 %v2002_v15  ;;  %2152 = vmatprep.subr.bf16.mxu1 %v2004_v4 }
 0xb63   :  { %2142 = vmatprep.mubr.bf16.mxu0 %v2019_v22  ;;  %2182 = vmatprep.mubr.bf16.mxu1 %v2021_v23 }
 0xb69   :  { %2113 = vmatpush1.bf16.xpose.msra.mxu0 %v2001_v58  ;;  %2153 = vmatpush1.bf16.xpose.msra.mxu1 %v2003_v7 }
 0xb6a   :  { %2190 = vmatprep.subr.bf16.mxu0 %v1990_v10  ;;  %2230 = vmatprep.subr.bf16.mxu1 %v1992_v11 }
 0xb70   :  { %2143 = vmatmul.mubr.bf16.vlgmr.msra.gmra.mrb[64].mxu0 %v2018_v46  ;;  %2183 = vmatmul.mubr.bf16.vlgmr.msra.gmra.mrb[60].mxu1 %v2020_v47 }
 0xb71   :  { %2191 = vmatpush1.bf16.xpose.msra.mxu0 %v1989_v38  ;;  %2231 = vmatpush1.bf16.xpose.msra.mxu1 %v1991_v2 }
 0xb72   :  { %2192 = vmatprep.subr.bf16.mxu0 %v2006_v16  ;;  %2232 = vmatprep.subr.bf16.mxu1 %v2008_v24 }
 0xb73   :  { %2222 = vmatprep.mubr.bf16.mxu0 %v2023_v26  ;;  %2262 = vmatprep.mubr.bf16.mxu1 %v2025_v60 }
 0xb79   :  { %2193 = vmatpush1.bf16.xpose.msra.mxu0 %v2005_v32  ;;  %2233 = vmatpush1.bf16.xpose.msra.mxu1 %v2007_v17 }
 0xb7a   :  { %2270 = vmatprep.subr.bf16.mxu0 %v1994_v21  ;;  %2310 = vmatprep.subr.bf16.mxu1 %v1996_v35 }
 0xb80   :  { %2223 = vmatmul.mubr.bf16.vlgmr.msra.gmra.mrb[68].mxu0 %v2022_v41  ;;  %2263 = vmatmul.mubr.bf16.vlgmr.msra.gmra.mrb[64].mxu1 %v2024_v28 }
 0xb81   :  { %2271 = vmatpush1.bf16.xpose.msra.mxu0 %v1993_v59  ;;  %2311 = vmatpush1.bf16.xpose.msra.mxu1 %v1995_v6 }
 0xb82   :  { %2272 = vmatprep.subr.bf16.mxu0 %v2010_v37  ;;  %2312 = vmatprep.subr.bf16.mxu1 %v2012_v27 }
 0xb83   :  { %2302 = vmatprep.mubr.bf16.mxu0 %v2027_v51  ;;  %2342 = vmatprep.mubr.bf16.mxu1 %v2029_v19 }
 0xb89   :  { %2273 = vmatpush1.bf16.xpose.msra.mxu0 %v2009_v34  ;;  %2313 = vmatpush1.bf16.xpose.msra.mxu1 %v2011_v40 }
 0xb90   :  { %2303 = vmatmul.mubr.bf16.vlgmr.msra.gmra.mrb[72].mxu0 %v2026_v49  ;;  %2343 = vmatmul.mubr.bf16.vlgmr.msra.gmra.mrb[68].mxu1 %v2028_v29  ;;  %v2351_v49 = vld [vmem:[%s4008_s5 + $0x68] ss:$0 sm:$0xff]  ;;  %v2352_v29 = vld [vmem:[%s4008_s5 + $0x70] ss:$0 sm:$0xff] }
 0xc33   :  { %v2064_v18 = vpop.f32.mrb[60].mxu0  ;;  %v2104_v39 = vpop.f32.mrb[56].mxu1 }
 0xc34   :  { %v2065_v50 = vadd.f32 %v2064_v18, %v2013_v25  ;;  %v2066_v20 = vpop.f32.mrb[61].mxu0  ;;  %v2106_v33 = vpop.f32.mrb[57].mxu1 }
 0xc35   :  { %v2067_v13 = vpop.f32.mrb[62].mxu0  ;;  %v2107_v0 = vpop.f32.mrb[58].mxu1 }
 0xc36   :  { %v2105_v30 = vadd.f32 %v2104_v39, %v2065_v50  ;;  %v2068_v48 = vpop.f32.mrb[63].mxu0  ;;  %v2108_v61 = vpop.f32.mrb[59].mxu1 }
 0xc43   :  { %v2144_v14 = vpop.f32.mrb[64].mxu0  ;;  %v2184_v31 = vpop.f32.mrb[60].mxu1 }
 0xc44   :  { %v2145_v8 = vadd.f32 %v2144_v14, %v2105_v30  ;;  %v2146_v36 = vpop.f32.mrb[65].mxu0  ;;  %v2186_v53 = vpop.f32.mrb[61].mxu1 }
 0xc45   :  { %v2147_v54 = vpop.f32.mrb[66].mxu0  ;;  %v2187_v5 = vpop.f32.mrb[62].mxu1 }
 0xc46   :  { %v2185_v1 = vadd.f32 %v2184_v31, %v2145_v8  ;;  %v2148_v55 = vpop.f32.mrb[67].mxu0  ;;  %v2188_v9 = vpop.f32.mrb[63].mxu1 }
 0xc53   :  { %v2224_v12 = vpop.f32.mrb[68].mxu0  ;;  %v2264_v15 = vpop.f32.mrb[64].mxu1 }
 0xc54   :  { %v2225_v4 = vadd.f32 %v2224_v12, %v2185_v1  ;;  %v2226_v22 = vpop.f32.mrb[69].mxu0  ;;  %v2266_v23 = vpop.f32.mrb[65].mxu1 }
 0xc55   :  { %v2227_v58 = vpop.f32.mrb[70].mxu0  ;;  %v2267_v7 = vpop.f32.mrb[66].mxu1 }
 0xc56   :  { %v2265_v10 = vadd.f32 %v2264_v15, %v2225_v4  ;;  %v2228_v11 = vpop.f32.mrb[71].mxu0  ;;  %v2268_v46 = vpop.f32.mrb[67].mxu1 }
 0xc63   :  { %v2304_v47 = vpop.f32.mrb[72].mxu0  ;;  %v2344_v38 = vpop.f32.mrb[68].mxu1 }
 0xc64   :  { %v2305_v2 = vadd.f32 %v2304_v47, %v2265_v10  ;;  %v2306_v16 = vpop.f32.mrb[73].mxu0  ;;  %v2346_v24 = vpop.f32.mrb[69].mxu1 }
 0xc65   :  { %v2307_v26 = vpop.f32.mrb[74].mxu0  ;;  %v2347_v60 = vpop.f32.mrb[70].mxu1 }
 0xc66   :  { %v2345_v32 = vadd.f32 %v2344_v38, %v2305_v2  ;;  %v2308_v17 = vpop.f32.mrb[75].mxu0  ;;  %v2348_v21 = vpop.f32.mrb[71].mxu1 }
 0xc68   :  { %v2350_v35 = vadd.f32 %v2345_v32, %v3720_v52 }
 0xc6a   :  { %v2353_v41 = vsel %vm503_vm2, %v2350_v35, 0.0 }
 0xc6b   :  { %2354 = vadd.xlane.f32.xlu0 %v2353_v41 }
 0xcf8   :  { %v2355_v28 = vpop.xlane.xlu0 %2354 }
 0xcf9   :  { %v2356_v59 = vmul.f32 0.03125, %v2355_v28 }
 0xcfb   :  { %v2357_v6 = vsub.f32 %v2350_v35, %v2356_v59 }
 0xcfd   :  { %v2358_v37 = vmul.f32 %v2357_v6, %v2357_v6 }
 0xcff   :  { %v2359_v27 = vsel %vm503_vm2, %v2358_v37, 0.0 }
 0xd00   :  { %2360 = vadd.xlane.f32.xlu0 %v2359_v27 }
 0xd8d   :  { %v2361_v51 = vpop.xlane.xlu0 %2360 }
 0xd8e   :  { %v2362_v19 = vmul.f32 0.03125, %v2361_v51 }
 0xd90   :  { %v2363_v34 = vadd.f32 1e-05, %v2362_v19 }
 0xd92   :  { %3239 = vrsqrt.f32 %v2363_v34 }
 0xd9c   :  { %v3240_v40 = vpop.eup %3239 }
 0xd9d   :  { %v2365_v52 = vmul.f32 %v3240_v40, %v2357_v6 }
 0xd9f   :  { %v2366_v25 = vmul.f32 %v2365_v52, %v2351_v49 }
 0xda1   :  { %v2367_v18 = vadd.f32 %v2366_v25, %v2352_v29 }
 0xda2   :  { %3273 = dma.done.wait [#allocation5 + $0x4], 5120 }
 0xda3   :  { %3274 = vsyncadd [#allocation5 + $0x4], 4294962176  ;;  %2560 = vmatprep.mubr.bf16.mxu0 %v3303_v3  ;;  %2601 = vmatprep.mubr.bf16.mxu1 %v3303_v3  ;;  %v2372_v39 = vld [vmem:[#allocation4 + $0x8] sm:$0xff]  ;;  %v2374_v50 = vld [vmem:[#allocation4 + $0x18] sm:$0xff]  ;;  %v3878_v31 = vpack.c.bf16 %v2367_v18, %v2367_v18 }
 0xda4   :  { %v2371_v20 = vld [vmem:[#allocation4] sm:$0xff]  ;;  %2528 = vmatprep.subr.bf16.mxu0 %v2372_v39  ;;  %2569 = vmatprep.subr.bf16.mxu1 %v2374_v50  ;;  %v2373_v33 = vld [vmem:[#allocation4 + $0x10] sm:$0xff]  ;;  %v2392_v13 = vld [vmem:[#allocation4 + $0xa8] sm:$0xff] }
 0xda5   :  { %v2394_v0 = vld [vmem:[#allocation4 + $0xb8] sm:$0xff]  ;;  %2529 = vmatpush1.bf16.msra.mxu0 %v2371_v20  ;;  %2570 = vmatpush1.bf16.msra.mxu1 %v2373_v33  ;;  %v2391_v30 = vld [vmem:[#allocation4 + $0xa0] sm:$0xff]  ;;  %v2393_v48 = vld [vmem:[#allocation4 + $0xb0] sm:$0xff] }
 0xda6   :  { %2530 = vmatprep.subr.bf16.mxu0 %v2392_v13  ;;  %2571 = vmatprep.subr.bf16.mxu1 %v2394_v0  ;;  %v2376_v61 = vld [vmem:[#allocation4 + $0x28] sm:$0xff]  ;;  %v2378_v14 = vld [vmem:[#allocation4 + $0x38] sm:$0xff]  ;;  %v2375_v8 = vld [vmem:[#allocation4 + $0x20] sm:$0xff] }
 0xda7   :  { %v2377_v36 = vld [vmem:[#allocation4 + $0x30] sm:$0xff]  ;;  %v2396_v53 = vld [vmem:[#allocation4 + $0xc8] sm:$0xff]  ;;  %v2398_v54 = vld [vmem:[#allocation4 + $0xd8] sm:$0xff] }
 0xda8   :  { %v2395_v5 = vld [vmem:[#allocation4 + $0xc0] sm:$0xff]  ;;  %v2397_v1 = vld [vmem:[#allocation4 + $0xd0] sm:$0xff]  ;;  %v2380_v55 = vld [vmem:[#allocation4 + $0x48] sm:$0xff] }
 0xda9   :  { %2531 = vmatpush1.bf16.msra.mxu0 %v2391_v30  ;;  %2572 = vmatpush1.bf16.msra.mxu1 %v2393_v48  ;;  %v2382_v9 = vld [vmem:[#allocation4 + $0x58] sm:$0xff]  ;;  %v2379_v12 = vld [vmem:[#allocation4 + $0x40] sm:$0xff]  ;;  %v2381_v15 = vld [vmem:[#allocation4 + $0x50] sm:$0xff] }
 0xdaa   :  { %2610 = vmatprep.subr.bf16.mxu0 %v2376_v61  ;;  %2651 = vmatprep.subr.bf16.mxu1 %v2378_v14  ;;  %v2400_v4 = vld [vmem:[#allocation4 + $0xe8] sm:$0xff]  ;;  %v2402_v22 = vld [vmem:[#allocation4 + $0xf8] sm:$0xff]  ;;  %v2399_v23 = vld [vmem:[#allocation4 + $0xe0] sm:$0xff] }
 0xdab   :  { %v2401_v58 = vld [vmem:[#allocation4 + $0xf0] sm:$0xff]  ;;  %v2384_v7 = vld [vmem:[#allocation4 + $0x68] sm:$0xff]  ;;  %v2386_v10 = vld [vmem:[#allocation4 + $0x78] sm:$0xff] }
 0xdac   :  { %3084 = vmatmul.mubr.msk.bf16.vlgmr.msra.gmra.mrb[76].mxu0 %vm503_vm2, %v3878_v31  ;;  %3085 = vmatmul.mubr.msk.bf16.vlgmr.msra.gmra.mrb[72].mxu1 %vm503_vm2, %v3878_v31  ;;  %v2383_v11 = vld [vmem:[#allocation4 + $0x60] sm:$0xff]  ;;  %v2385_v46 = vld [vmem:[#allocation4 + $0x70] sm:$0xff]  ;;  %v2404_v47 = vld [vmem:[#allocation4 + $0x108] sm:$0xff] }
 0xdad   :  { %2611 = vmatpush1.bf16.msra.mxu0 %v2375_v8  ;;  %2652 = vmatpush1.bf16.msra.mxu1 %v2377_v36  ;;  %v2406_v38 = vld [vmem:[#allocation4 + $0x118] sm:$0xff]  ;;  %v2403_v2 = vld [vmem:[#allocation4 + $0x100] sm:$0xff]  ;;  %v2405_v16 = vld [vmem:[#allocation4 + $0x110] sm:$0xff] }
 0xdae   :  { %2612 = vmatprep.subr.bf16.mxu0 %v2396_v53  ;;  %2653 = vmatprep.subr.bf16.mxu1 %v2398_v54  ;;  %v2388_v24 = vld [vmem:[#allocation4 + $0x88] sm:$0xff]  ;;  %v2390_v26 = vld [vmem:[#allocation4 + $0x98] sm:$0xff]  ;;  %v2387_v60 = vld [vmem:[#allocation4 + $0x80] sm:$0xff] }
 0xdaf   :  { %2642 = vmatprep.mubr.bf16.mxu0 %v3303_v3  ;;  %2683 = vmatprep.mubr.bf16.mxu1 %v3303_v3  ;;  %v2389_v32 = vld [vmem:[#allocation4 + $0x90] sm:$0xff]  ;;  %v2408_v17 = vld [vmem:[#allocation4 + $0x128] sm:$0xff]  ;;  %v2410_v21 = vld [vmem:[#allocation4 + $0x138] sm:$0xff] }
 0xdb0   :  { %v2407_v35 = vld [vmem:[#allocation4 + $0x120] sm:$0xff]  ;;  %v2409_v41 = vld [vmem:[#allocation4 + $0x130] sm:$0xff] }
 0xdb1   :  { %2613 = vmatpush1.bf16.msra.mxu0 %v2395_v5  ;;  %2654 = vmatpush1.bf16.msra.mxu1 %v2397_v1  ;;  %v3079_v28 = vld [vmem:[%s4008_s5 + $0x3] ss:$8 sm:$0xf] }
 0xdb2   :  { %2692 = vmatprep.subr.bf16.mxu0 %v2380_v55  ;;  %2733 = vmatprep.subr.bf16.mxu1 %v2382_v9  ;;  %v3080_v59 = vld [vmem:[%s4008_s5 + $0x3] ss:$8 sm:$0xf0] }
 0xdb3   :  { %v2414_v6 = vor.u32 %v3080_v59, %v3079_v28  ;;  %v3081_v36 = vld [vmem:[%s4008_s5 + $0x43] ss:$8 sm:$0xf] }
 0xdb4   :  { %3086 = vmatmul.mubr.msk.bf16.vlgmr.msra.gmra.mrb[80].mxu0 %vm503_vm2, %v3878_v31  ;;  %3087 = vmatmul.mubr.msk.bf16.vlgmr.msra.gmra.mrb[76].mxu1 %vm503_vm2, %v3878_v31  ;;  %v3082_v53 = vld [vmem:[%s4008_s5 + $0x43] ss:$8 sm:$0xf0] }
 0xdb5   :  { %2693 = vmatpush1.bf16.msra.mxu0 %v2379_v12  ;;  %2734 = vmatpush1.bf16.msra.mxu1 %v2381_v15  ;;  %v2428_v37 = vrot.slane %v2414_v6, %v3552_v42  ;;  %v2432_v27 = vrot.slane %v2414_v6, %v3556_v44  ;;  %v2440_v51 = vrot.slane %v2414_v6, %v3558_v45 }
 0xdb6   :  { %2694 = vmatprep.subr.bf16.mxu0 %v2400_v4  ;;  %2735 = vmatprep.subr.bf16.mxu1 %v2402_v22  ;;  %v2444_v61 = vrot.slane %v2414_v6, %v3568_v56  ;;  %v2452_v14 = vrot.slane %v2414_v6, %v3570_v57  ;;  %v2456_v8 = vrot.slane %v2414_v6, %v3578_v63 }
 0xdb7   :  { %2724 = vmatprep.mubr.bf16.mxu0 %v3303_v3  ;;  %2765 = vmatprep.mubr.bf16.mxu1 %v3303_v3  ;;  %v2418_v15 = vor.u32 %v3082_v53, %v3081_v36 }
 0xdb9   :  { %2695 = vmatpush1.bf16.msra.mxu0 %v2399_v23  ;;  %2736 = vmatpush1.bf16.msra.mxu1 %v2401_v58 }
 0xdba   :  { %2774 = vmatprep.subr.bf16.mxu0 %v2384_v7  ;;  %2815 = vmatprep.subr.bf16.mxu1 %v2386_v10 }
 0xdbc   :  { %3088 = vmatmul.mubr.msk.bf16.vlgmr.msra.gmra.mrb[84].mxu0 %vm503_vm2, %v3878_v31  ;;  %3089 = vmatmul.mubr.msk.bf16.vlgmr.msra.gmra.mrb[80].mxu1 %vm503_vm2, %v3878_v31 }
 0xdbd   :  { %2775 = vmatpush1.bf16.msra.mxu0 %v2383_v11  ;;  %2816 = vmatpush1.bf16.msra.mxu1 %v2385_v46 }
 0xdbe   :  { %2776 = vmatprep.subr.bf16.mxu0 %v2404_v47  ;;  %2817 = vmatprep.subr.bf16.mxu1 %v2406_v38 }
 0xdbf   :  { %2806 = vmatprep.mubr.bf16.mxu0 %v3303_v3  ;;  %2847 = vmatprep.mubr.bf16.mxu1 %v3303_v3 }
 0xdc1   :  { %2777 = vmatpush1.bf16.msra.mxu0 %v2403_v2  ;;  %2818 = vmatpush1.bf16.msra.mxu1 %v2405_v16  ;;  %v2460_v2 = vrot.slane %v2418_v15, %v3552_v42  ;;  %v2468_v16 = vrot.slane %v2418_v15, %v3554_v43 }
 0xdc2   :  { %2856 = vmatprep.subr.bf16.mxu0 %v2388_v24  ;;  %2897 = vmatprep.subr.bf16.mxu1 %v2390_v26  ;;  %v2464_v24 = vrot.slane %v2418_v15, %v3556_v44  ;;  %v2472_v26 = vrot.slane %v2418_v15, %v3558_v45 }
 0xdc4   :  { %3090 = vmatmul.mubr.msk.bf16.vlgmr.msra.gmra.mrb[88].mxu0 %vm503_vm2, %v3878_v31  ;;  %3091 = vmatmul.mubr.msk.bf16.vlgmr.msra.gmra.mrb[84].mxu1 %vm503_vm2, %v3878_v31 }
 0xdc5   :  { %2857 = vmatpush1.bf16.msra.mxu0 %v2387_v60  ;;  %2898 = vmatpush1.bf16.msra.mxu1 %v2389_v32 }
 0xdc6   :  { %2858 = vmatprep.subr.bf16.mxu0 %v2408_v17  ;;  %2899 = vmatprep.subr.bf16.mxu1 %v2410_v21 }
 0xdc7   :  { %2888 = vmatprep.mubr.bf16.mxu0 %v3303_v3  ;;  %2929 = vmatprep.mubr.bf16.mxu1 %v3303_v3  ;;  %v2436_v3 = vrot.slane %v2414_v6, %v3554_v43 }
 0xdc9   :  { %2859 = vmatpush1.bf16.msra.mxu0 %v2407_v35  ;;  %2900 = vmatpush1.bf16.msra.mxu1 %v2409_v41 }
 0xdcc   :  { %3092 = vmatmul.mubr.msk.bf16.vlgmr.msra.gmra.mrb[92].mxu0 %vm503_vm2, %v3878_v31  ;;  %3093 = vmatmul.mubr.msk.bf16.vlgmr.msra.gmra.mrb[88].mxu1 %vm503_vm2, %v3878_v31  ;;  %v2448_v31 = vrot.slane %v2414_v6, %v3576_v62 }
 0xe7f   :  { %v2562_v19 = vpop.f32.mrb[76].mxu0  ;;  %v2603_v34 = vpop.f32.mrb[72].mxu1 }
 0xe80   :  { %v2563_v40 = vadd.f32 %v2562_v19, %v2428_v37  ;;  %v2604_v49 = vadd.f32 %v2603_v34, %v2436_v3  ;;  %v2564_v52 = vpop.f32.mrb[77].mxu0  ;;  %v2605_v29 = vpop.f32.mrb[73].mxu1 }
 0xe81   :  { %v2565_v25 = vadd.f32 %v2564_v52, %v2432_v27  ;;  %v2606_v18 = vadd.f32 %v2605_v29, %v2440_v51  ;;  %v2566_v39 = vpop.f32.mrb[78].mxu0  ;;  %v2607_v50 = vpop.f32.mrb[74].mxu1  ;;  %v2484_v52 = vrot.slane %v2418_v15, %v3570_v57  ;;  %v2480_v29 = vrot.slane %v2418_v15, %v3576_v62 }
 0xe82   :  { %v2938_v20 = vmax.f32 %v2563_v40, 0.0  ;;  %v2940_v33 = vmax.f32 %v2604_v49, 0.0  ;;  %v2567_v13 = vpop.f32.mrb[79].mxu0  ;;  %v2608_v0 = vpop.f32.mrb[75].mxu1  ;;  %v2476_v49 = vrot.slane %v2418_v15, %v3568_v56 }
 0xe83   :  { %v2939_v30 = vmax.f32 %v2565_v25, 0.0  ;;  %v2941_v48 = vmax.f32 %v2606_v18, 0.0  ;;  %v2488_v25 = vrot.slane %v2418_v15, %v3578_v63 }
 0xe84   :  { %2958 = vst [vmem:[%s4012_s9] sm:$0xff] %v2938_v20  ;;  %2960 = vst [vmem:[%s4012_s9 + $0x10] sm:$0xff] %v2940_v33 }
 0xe85   :  { %2959 = vst [vmem:[%s4012_s9 + $0x8] sm:$0xff] %v2939_v30  ;;  %2961 = vst [vmem:[%s4012_s9 + $0x18] sm:$0xff] %v2941_v48  ;;  %v3083_v48 = vld [vmem:[%s4008_s5 + $0x83] ss:$8 sm:$0xf] }
 0xe86   :  { %v2492_v36 = vrot.slane %v3083_v48, %v3552_v42  ;;  %v2500_v53 = vrot.slane %v3083_v48, %v3554_v43 }
 0xe87   :  { %v2644_v54 = vpop.f32.mrb[80].mxu0  ;;  %v2685_v5 = vpop.f32.mrb[76].mxu1 }
 0xe88   :  { %v2645_v1 = vadd.f32 %v2644_v54, %v2444_v61  ;;  %v2686_v55 = vadd.f32 %v2685_v5, %v2452_v14  ;;  %v2646_v9 = vpop.f32.mrb[81].mxu0  ;;  %v2687_v12 = vpop.f32.mrb[77].mxu1  ;;  %v2496_v54 = vrot.slane %v3083_v48, %v3556_v44  ;;  %v2504_v5 = vrot.slane %v3083_v48, %v3558_v45 }
 0xe89   :  { %v2647_v4 = vadd.f32 %v2646_v9, %v2448_v31  ;;  %v2688_v22 = vadd.f32 %v2687_v12, %v2456_v8  ;;  %v2648_v23 = vpop.f32.mrb[82].mxu0  ;;  %v2689_v58 = vpop.f32.mrb[78].mxu1 }
 0xe8a   :  { %v2942_v7 = vmax.f32 %v2645_v1, 0.0  ;;  %v2944_v10 = vmax.f32 %v2686_v55, 0.0  ;;  %v2649_v11 = vpop.f32.mrb[83].mxu0  ;;  %v2690_v46 = vpop.f32.mrb[79].mxu1 }
 0xe8b   :  { %v2943_v47 = vmax.f32 %v2647_v4, 0.0  ;;  %v2945_v38 = vmax.f32 %v2688_v22, 0.0 }
 0xe8c   :  { %2962 = vst [vmem:[%s4012_s9 + $0x20] sm:$0xff] %v2942_v7  ;;  %2964 = vst [vmem:[%s4012_s9 + $0x30] sm:$0xff] %v2944_v10 }
 0xe8d   :  { %2963 = vst [vmem:[%s4012_s9 + $0x28] sm:$0xff] %v2943_v47  ;;  %2965 = vst [vmem:[%s4012_s9 + $0x38] sm:$0xff] %v2945_v38 }
 0xe8f   :  { %v2726_v60 = vpop.f32.mrb[84].mxu0  ;;  %v2767_v32 = vpop.f32.mrb[80].mxu1 }
 0xe90   :  { %v2727_v17 = vadd.f32 %v2726_v60, %v2460_v2  ;;  %v2768_v21 = vadd.f32 %v2767_v32, %v2468_v16  ;;  %v2728_v35 = vpop.f32.mrb[85].mxu0  ;;  %v2769_v41 = vpop.f32.mrb[81].mxu1 }
 0xe91   :  { %v2729_v28 = vadd.f32 %v2728_v35, %v2464_v24  ;;  %v2770_v59 = vadd.f32 %v2769_v41, %v2472_v26  ;;  %v2730_v6 = vpop.f32.mrb[86].mxu0  ;;  %v2771_v37 = vpop.f32.mrb[82].mxu1 }
 0xe92   :  { %v2946_v3 = vmax.f32 %v2727_v17, 0.0  ;;  %v2948_v27 = vmax.f32 %v2768_v21, 0.0  ;;  %v2731_v51 = vpop.f32.mrb[87].mxu0  ;;  %v2772_v19 = vpop.f32.mrb[83].mxu1 }
 0xe93   :  { %v2947_v34 = vmax.f32 %v2729_v28, 0.0  ;;  %v2949_v40 = vmax.f32 %v2770_v59, 0.0 }
 0xe94   :  { %2966 = vst [vmem:[%s4012_s9 + $0x40] sm:$0xff] %v2946_v3  ;;  %2968 = vst [vmem:[%s4012_s9 + $0x50] sm:$0xff] %v2948_v27 }
 0xe95   :  { %2967 = vst [vmem:[%s4012_s9 + $0x48] sm:$0xff] %v2947_v34  ;;  %2969 = vst [vmem:[%s4012_s9 + $0x58] sm:$0xff] %v2949_v40 }
 0xe97   :  { %v2808_v18 = vpop.f32.mrb[88].mxu0  ;;  %v2849_v39 = vpop.f32.mrb[84].mxu1 }
 0xe98   :  { %v2809_v50 = vadd.f32 %v2808_v18, %v2476_v49  ;;  %v2850_v20 = vadd.f32 %v2849_v39, %v2484_v52  ;;  %v2810_v33 = vpop.f32.mrb[89].mxu0  ;;  %v2851_v56 = vpop.f32.mrb[85].mxu1 }
 0xe99   :  { %v2811_v13 = vadd.f32 %v2810_v33, %v2480_v29  ;;  %v2852_v57 = vadd.f32 %v2851_v56, %v2488_v25  ;;  %v2812_v0 = vpop.f32.mrb[90].mxu0  ;;  %v2853_v30 = vpop.f32.mrb[86].mxu1 }
 0xe9a   :  { %v2950_v61 = vmax.f32 %v2809_v50, 0.0  ;;  %v2952_v14 = vmax.f32 %v2850_v20, 0.0  ;;  %v2813_v31 = vpop.f32.mrb[91].mxu0  ;;  %v2854_v62 = vpop.f32.mrb[87].mxu1 }
 0xe9b   :  { %v2951_v8 = vmax.f32 %v2811_v13, 0.0  ;;  %v2953_v63 = vmax.f32 %v2852_v57, 0.0 }
 0xe9c   :  { %2970 = vst [vmem:[%s4012_s9 + $0x60] sm:$0xff] %v2950_v61  ;;  %2972 = vst [vmem:[%s4012_s9 + $0x70] sm:$0xff] %v2952_v14 }
 0xe9d   :  { %2971 = vst [vmem:[%s4012_s9 + $0x68] sm:$0xff] %v2951_v8  ;;  %2973 = vst [vmem:[%s4012_s9 + $0x78] sm:$0xff] %v2953_v63 }
 0xe9f   :  { %v2890_v1 = vpop.f32.mrb[92].mxu0  ;;  %v2931_v55 = vpop.f32.mrb[88].mxu1 }
 0xea0   :  { %v2891_v9 = vadd.f32 %v2890_v1, %v2492_v36  ;;  %v2932_v12 = vadd.f32 %v2931_v55, %v2500_v53  ;;  %v2892_v15 = vpop.f32.mrb[93].mxu0  ;;  %v2933_v42 = vpop.f32.mrb[89].mxu1 }
 0xea1   :  { %v2893_v4 = vadd.f32 %v2892_v15, %v2496_v54  ;;  %v2934_v43 = vadd.f32 %v2933_v42, %v2504_v5  ;;  %v2894_v22 = vpop.f32.mrb[94].mxu0  ;;  %v2935_v23 = vpop.f32.mrb[90].mxu1 }
 0xea2   :  { %v2954_v58 = vmax.f32 %v2891_v9, 0.0  ;;  %v2956_v7 = vmax.f32 %v2932_v12, 0.0  ;;  %v2895_v10 = vpop.f32.mrb[95].mxu0  ;;  %v2936_v11 = vpop.f32.mrb[91].mxu1 }
 0xea3   :  { %v2955_v46 = vmax.f32 %v2893_v4, 0.0  ;;  %v2957_v47 = vmax.f32 %v2934_v43, 0.0 }
 0xea4   :  { %2974 = vst [vmem:[%s4012_s9 + $0x80] sm:$0xff] %v2954_v58  ;;  %2976 = vst [vmem:[%s4012_s9 + $0x90] sm:$0xff] %v2956_v7 }
 0xea5   :  { %2975 = vst [vmem:[%s4012_s9 + $0x88] sm:$0xff] %v2955_v46  ;;  %2977 = vst [vmem:[%s4012_s9 + $0x98] sm:$0xff] %v2957_v47 }
 0xea6   :  { %2982 = vsyncpa [#allocation7], 1 }
 0xea7   :  { %2983 = vsyncmov [#allocation5] }
 0xeaa   :  { %s2984_s17 = vpop.sfrf %2983 }
 0xeab   :  { %p3094_p8 = scmp.ne.s32.totalorder %s2984_s17, 0 }
 0xead   :  { %2988 = shalt.err (%p3094_p8)  }
 0xeae   :  { %2990 = vsyncmov [#allocation5 + $0x1] }
 0xeb1   :  { %s2991_s24 = vpop.sfrf %2990 }
 0xeb2   :  { %p3095_p9 = scmp.ne.s32.totalorder %s2991_s24, 0 }
 0xeb4   :  { %2995 = shalt.err (%p3095_p9)  }
 0xeb5   :  { %2997 = vsyncmov [#allocation5 + $0x2] }
 0xeb8   :  { %s2998_s18 = vpop.sfrf %2997 }
 0xeb9   :  { %p3096_p10 = scmp.ne.s32.totalorder %s2998_s18, 0 }
 0xebb   :  { %3002 = shalt.err (%p3096_p10)  }
 0xebc   :  { %3004 = vsyncmov [#allocation5 + $0x3] }
 0xebf   :  { %s3005_s30 = vpop.sfrf %3004 }
 0xec0   :  { %p3097_p11 = scmp.ne.s32.totalorder %s3005_s30, 0 }
 0xec2   :  { %3009 = shalt.err (%p3097_p11)  }
 0xec3   :  { %3011 = vsyncmov [#allocation5 + $0x4] }
 0xec6   :  { %s3012_s7 = vpop.sfrf %3011 }
 0xec7   :  { %p3098_p12 = scmp.ne.s32.totalorder %s3012_s7, 0 }
 0xec9   :  { %3016 = shalt.err (%p3098_p12)  }

</bundles_post_ra>
